<compile_context>
chip_gen: v6e
topology: v6e:2x2x1
jax: 0.10.0
libtpu: 0.0.40
codegen_flags: <defaults>
</compile_context>

<pallas_src>
import math

import numpy as np
import jax
import jax.numpy as jnp
from jax.experimental import pallas as pl
from jax.experimental.pallas import tpu as pltpu

# ----------------------- model configuration (small synthetic sizes) -----------------
IN_CHANNELS = 16          # d
N_HEAD = 4
D_K = 4
D_MODEL = 32              # hiddens[0] == d_model
HIDDENS = [32, 16]        # [d_model, hid_last]
T_PE = 1000
EPS = 1e-5


# ----------------------------- positional encoder (glue, plain JAX) ------------------
def positional_encoding(bp, d_model, n_head, T):
    """bp: (B, S) float positions -> (B, S, d_model) sinusoid table (repeat=n_head)."""
    d = d_model // n_head
    i = jnp.arange(d)
    denom = jnp.power(jnp.float32(T), 2.0 * (i // 2).astype(jnp.float32) / d)
    tab = bp[:, :, None] / denom[None, None, :]
    tab = jnp.where((i % 2) == 0, jnp.sin(tab), jnp.cos(tab))
    return jnp.tile(tab, (1, 1, n_head))


# ----------------------------------- Pallas kernel -----------------------------------
def _make_kernel(S, D_in, d_model, G, hid, P):
    SG = S * G          # stacked score rows (head-major, then time)
    SD = S * D_in       # stacked input rows  (time-major)

    def kernel(x_ref, bias_ref, wproj_ref, battn_ref, hexp_ref, min_ref,
               w1_ref, b1_ref, mout_ref, gout_ref, bout_ref, out_ref):
        x3 = x_ref[...]                                         # (S, D_in, P) channels-major tile

        # ---------- input GroupNorm: per pixel, stats over (S, channels-in-group) ------
        s1 = jnp.sum(x3, axis=0)                                                    # (D_in, P)
        mc = jnp.dot(min_ref[...], s1, preferred_element_type=jnp.float32)          # group mean / chan
        dx = x3 - mc[None]                                                          # (S, D_in, P)
        s2 = jnp.sum(dx * dx, axis=0)                                               # (D_in, P)
        vc = jnp.dot(min_ref[...], s2, preferred_element_type=jnp.float32)          # group var / chan
        ic = jax.lax.rsqrt(vc + EPS)                                                # (D_in, P)
        xn = (dx * ic[None]).reshape(SD, P)     # (S*D_in, P); GN gamma/beta folded into weights

        # ---------- one block-diagonal projection: scores + values, K = S*D_in ---------
        proj = jnp.dot(wproj_ref[...], xn,
                       preferred_element_type=jnp.float32) + bias_ref[...]          # (SG+S*dm, P)
        sc = proj[:SG]                          # (S*G, P), rows ordered (head g, time s)
        h = proj[SG:]                           # (S*d_model, P), rows ordered (time s, channel c)

        # ---------- softmax over time (native sublane reductions per head slab) --------
        sc_r = sc.reshape(G, S, P)                                                  # free reshape
        m = jnp.max(sc_r, axis=1, keepdims=True)                                    # (G, 1, P)
        e = jnp.exp(sc_r - m)                                                       # (G, S, P)
        inv_den = 1.0 / jnp.sum(e, axis=1)      # (G, P) exact (approx vrcp rejected: GN(4) downstream)
        # TODO(synk): attention dropout (p=0.1) omitted -> inference-mode identity.

        # ---------- attention-weighted pooling over time --------------------------------
        a_exp = jnp.dot(battn_ref[...], e.reshape(SG, P),
                        preferred_element_type=jnp.float32)                          # (S*d_model, P)
        o = jnp.sum((a_exp * h).reshape(S, d_model, P), axis=0)                      # (d_model, P)
        o = o * jnp.dot(hexp_ref[...], inv_den, preferred_element_type=jnp.float32)  # normalize / head

        # ---------- MLP: Linear (BatchNorm1d eval folded in) -> ReLU --------------------
        # TODO(synk): output dropout (p=0.2) omitted -> inference-mode identity.
        z = jnp.dot(w1_ref[...], o, preferred_element_type=jnp.float32) + b1_ref[...]
        z = jnp.maximum(z, 0.0)                                                      # (hid, P)

        # ---------- output GroupNorm over channels, per pixel ---------------------------
        mco = jnp.dot(mout_ref[...], z, preferred_element_type=jnp.float32)          # (hid, P)
        dz = z - mco
        vco = jnp.dot(mout_ref[...], dz * dz, preferred_element_type=jnp.float32)
        ico = jax.lax.rsqrt(vco + EPS)
        out_ref[...] = dz * ico * gout_ref[...] + bout_ref[...]                      # (hid, P)

    return kernel


# ----------------------------------- wrapper ------------------------------------------
def ltae_pallas(x, batch_positions, p):
    B, S, D_in, H, W = x.shape
    HW = H * W
    G, d_k, d_model, hid = N_HEAD, D_K, D_MODEL, HIDDENS[-1]
    d_head = d_model // G
    cg = D_in // G
    cgo = hid // G
    temp = math.sqrt(d_k)
    bn_scale = 1.0 / math.sqrt(1.0 + EPS)    # BatchNorm1d eval with running stats (0, 1)
    f32 = jnp.float32

    # ---- pixel-tile selection: pad lane axis to a multiple of 128 (lane-dense stores) --
    HW_pad = max(128, ((HW + 127) // 128) * 128)
    P = 128
    for cand in (2048, 1024, 512, 256, 128):
        if HW_pad % cand == 0:
            P = cand
            break
    n_t = HW_pad // P

    # native-layout input view (B, S, C, H*W); pad pixel axis with zeros (lane-independent
    # math -> padded lanes stay finite and are sliced off below).
    x_r = x.reshape(B, S, D_in, HW)
    if HW_pad != HW:
        x_r = jnp.pad(x_r, ((0, 0), (0, 0), (0, 0), (0, HW_pad - HW)))

    gin = p["gin"].reshape(D_in).astype(f32)
    bin_ = p["bin"].reshape(D_in).astype(f32)

    # ---- host-side algebraic fusions (exact, f32) ---------------------------------------
    pe = positional_encoding(batch_positions.astype(f32), d_model, G, T_PE)          # (B, S, dm)
    pe2 = pe + p["bcin"].reshape(d_model) + p["win"] @ bin_      # conv bias + GN beta folded in
    win_g = p["win"] * gin[None, :]                              # GN gamma folded into 1x1 conv
    wk_r = p["wk"].reshape(G, d_k, d_model)
    w_score = jnp.einsum("gkd,gk->dg", wk_r, p["Q"])             # (d_model, G)
    b_score = jnp.einsum("gk,gk->g", p["Q"], p["bk"].reshape(G, d_k))
    wsc_g = (w_score.T @ win_g) / temp                           # (G, D_in): scores = wsc_g @ xn_hat
    csc = (jnp.einsum("bsd,dg->bsg", pe2, w_score) + b_score) / temp                  # (B, S, G)

    # block-diagonal "all timesteps at once" projection weight (K = S*D_in)
    eye_S = jnp.eye(S, dtype=f32)
    wsc_bd = jnp.einsum("gi,st->gsti", wsc_g, eye_S).reshape(G * S, S * D_in)  # rows (g, s)
    win_bd = jnp.kron(eye_S, win_g)                                            # rows (s, c)
    w_proj = jnp.concatenate([wsc_bd, win_bd], axis=0)           # (S*G + S*d_model, S*D_in)
    bias_proj = jnp.concatenate(
        [jnp.transpose(csc, (0, 2, 1)).reshape(B, G * S),        # score constants, (g, s) order
         pe2.reshape(B, S * d_model)], axis=1)[..., None]        # (B, S*G + S*d_model, 1)

    # constant matrices passed as operands (Pallas kernels may not capture array constants)
    head_exp_np = np.kron(np.eye(G, dtype=np.float32), np.ones((d_head, 1), np.float32))
    head_exp = jnp.asarray(head_exp_np)                                               # (dm, G)
    bd_attn = jnp.asarray(np.einsum("mg,st->smgt", head_exp_np,
                                    np.eye(S, dtype=np.float32))
                          .reshape(S * d_model, G * S))                                # (S*dm, S*G)
    m_in = jnp.asarray(np.kron(np.eye(G, dtype=np.float32),
                               np.ones((cg, cg), np.float32)) / float(S * cg))         # (D_in, D_in)
    m_out = jnp.asarray(np.kron(np.eye(G, dtype=np.float32),
                                np.ones((cgo, cgo), np.float32)) / float(cgo))          # (hid, hid)

    # fold BatchNorm1d (eval) into the MLP linear
    bnw = p["bng"].reshape(hid) * bn_scale
    w1f = p["w1"] * bnw[:, None]                                                        # (hid, dm)
    b1f = (p["b1"].reshape(hid) * bnw + p["bnb"].reshape(hid))[:, None]                 # (hid, 1)
    gout = p["gout"].reshape(hid, 1).astype(f32)
    bout = p["bout"].reshape(hid, 1).astype(f32)

    kernel = _make_kernel(S, D_in, d_model, G, hid, P)
    SGM = S * G + S * d_model

    in_specs = [
        pl.BlockSpec((None, S, D_in, P), lambda b, t: (b, 0, 0, t)),   # x, native layout (padded)
        pl.BlockSpec((None, SGM, 1), lambda b, t: (b, 0, 0)),          # fused per-(b,s) bias column
        pl.BlockSpec((SGM, S * D_in), lambda b, t: (0, 0)),            # block-diag score+value weight
        pl.BlockSpec((S * d_model, S * G), lambda b, t: (0, 0)),       # attn head->channel expansion
        pl.BlockSpec((d_model, G), lambda b, t: (0, 0)),               # head->channel broadcast
        pl.BlockSpec((D_in, D_in), lambda b, t: (0, 0)),               # in-GroupNorm group-average
        pl.BlockSpec((hid, d_model), lambda b, t: (0, 0)),             # MLP weight (BN folded)
        pl.BlockSpec((hid, 1), lambda b, t: (0, 0)),                   # MLP bias (BN folded)
        pl.BlockSpec((hid, hid), lambda b, t: (0, 0)),                 # out-GroupNorm group-average
        pl.BlockSpec((hid, 1), lambda b, t: (0, 0)),                   # out_norm gamma
        pl.BlockSpec((hid, 1), lambda b, t: (0, 0)),                   # out_norm beta
    ]
    out_specs = pl.BlockSpec((None, hid, P), lambda b, t: (b, 0, t))   # channels-major, lane-dense

    # NOTE: if profiling ever shows exposed input DMA, add pipeline_mode=pl.Buffered(3) on
    # the x spec only (all other operands have constant index_maps and stay resident).
    out = pl.pallas_call(
        kernel,
        out_shape=jax.ShapeDtypeStruct((B, hid, HW_pad), f32),
        grid=(B, n_t),
        in_specs=in_specs,
        out_specs=out_specs,
        compiler_params=pltpu.CompilerParams(
            dimension_semantics=("parallel", "parallel"),
            vmem_limit_bytes=32 * 1024 * 1024),
    )(x_r, bias_proj, w_proj, bd_attn, head_exp, m_in, w1f, b1f, m_out, gout, bout)

    # drop padded pixel columns; already (B, hid, H*W) so no transpose needed.
    return out[:, :, :HW].reshape(B, hid, H, W)


# ------------------------------ pure-JAX reference ------------------------------------
def ltae_reference(x, bp, p):
    B, S, D, H, W = x.shape
    N = B * H * W
    G, d_k, dm, hid = N_HEAD, D_K, D_MODEL, HIDDENS[-1]
    dh = dm // G

    out = jnp.transpose(x, (0, 3, 4, 1, 2)).reshape(N, S, D)
    xg = out.reshape(N, S, G, D // G)
    mu = jnp.mean(xg, axis=(1, 3), keepdims=True)
    var = jnp.mean((xg - mu) ** 2, axis=(1, 3), keepdims=True)
    out = ((xg - mu) / jnp.sqrt(var + EPS)).reshape(N, S, D) * p["gin"] + p["bin"]
    out = out @ p["win"].T + p["bcin"]
    pe = positional_encoding(bp.astype(jnp.float32), dm, G, T_PE)
    out = out + jnp.repeat(pe, H * W, axis=0)

    k = (out @ p["wk"].T + p["bk"]).reshape(N, S, G, d_k)
    scores = jnp.einsum("nsgk,gk->ngs", k, p["Q"]) / math.sqrt(d_k)
    attn = jax.nn.softmax(scores, axis=-1)
    v = out.reshape(N, S, G, dh)
    o = jnp.einsum("ngs,nsgd->ngd", attn, v).reshape(N, dm)

    z = o @ p["w1"].T + p["b1"]
    z = z / jnp.sqrt(1.0 + EPS) * p["bng"] + p["bnb"]
    z = jnp.maximum(z, 0.0)
    zg = z.reshape(N, G, hid // G)
    mu = jnp.mean(zg, axis=2, keepdims=True)
    var = jnp.mean((zg - mu) ** 2, axis=2, keepdims=True)
    z = ((zg - mu) / jnp.sqrt(var + EPS)).reshape(N, hid) * p["gout"] + p["bout"]
    return jnp.transpose(z.reshape(B, H, W, hid), (0, 3, 1, 2))


# ---------------------------------------- main ----------------------------------------
if __name__ == "__main__":
    B, S, H, W = 2, 8, 4, 4
    D_in, G, d_k, d_model, hid = IN_CHANNELS, N_HEAD, D_K, D_MODEL, HIDDENS[-1]

    keys = jax.random.split(jax.random.PRNGKey(0), 16)
    x = jax.random.normal(keys[0], (B, S, D_in, H, W), jnp.float32)
    batch_positions = (jnp.arange(S, dtype=jnp.float32)[None, :] * 30.0
                       + jnp.arange(B, dtype=jnp.float32)[:, None] * 3.0)

    params = {
        "gin":  1.0 + 0.1 * jax.random.normal(keys[1], (1, D_in), jnp.float32),
        "bin":  0.1 * jax.random.normal(keys[2], (1, D_in), jnp.float32),
        "win":  jax.random.normal(keys[3], (d_model, D_in), jnp.float32) * math.sqrt(2.0 / D_in),
        "bcin": 0.1 * jax.random.normal(keys[4], (1, d_model), jnp.float32),
        "Q":    jax.random.normal(keys[5], (G, d_k), jnp.float32) * math.sqrt(2.0 / d_k),
        "wk":   jax.random.normal(keys[6], (G * d_k, d_model), jnp.float32) * math.sqrt(2.0 / d_k),
        "bk":   0.1 * jax.random.normal(keys[7], (1, G * d_k), jnp.float32),
        "w1":   jax.random.normal(keys[8], (hid, d_model), jnp.float32) * math.sqrt(2.0 / d_model),
        "b1":   0.1 * jax.random.normal(keys[9], (1, hid), jnp.float32),
        "bng":  1.0 + 0.1 * jax.random.normal(keys[10], (1, hid), jnp.float32),
        "bnb":  0.1 * jax.random.normal(keys[11], (1, hid), jnp.float32),
        "gout": 1.0 + 0.1 * jax.random.normal(keys[12], (1, hid), jnp.float32),
        "bout": 0.1 * jax.random.normal(keys[13], (1, hid), jnp.float32),
    }

    out = ltae_pallas(x, batch_positions, params)
    out = jax.block_until_ready(out)
    assert out.shape == (B, hid, H, W), out.shape
    assert bool(jnp.all(jnp.isfinite(out)))

    ref = ltae_reference(x, batch_positions, params)
    assert bool(jnp.allclose(out, ref, rtol=1e-2, atol=1e-2)), (
        float(jnp.max(jnp.abs(out - ref))))

    print("KERNEL_OK")
</pallas_src>

<mosaic_0001>
module attributes {stable_mosaic.version = 11 : i64} {
  func.func @kernel(%arg0: i32, %arg1: i32, %arg2: memref<1x8x16x128xf32, #tpu.memory_space<vmem>>, %arg3: memref<1x288x1xf32, #tpu.memory_space<vmem>>, %arg4: memref<288x128xf32, #tpu.memory_space<vmem>>, %arg5: memref<256x32xf32, #tpu.memory_space<vmem>>, %arg6: memref<32x4xf32, #tpu.memory_space<vmem>>, %arg7: memref<16x16xf32, #tpu.memory_space<vmem>>, %arg8: memref<16x32xf32, #tpu.memory_space<vmem>>, %arg9: memref<16x1xf32, #tpu.memory_space<vmem>>, %arg10: memref<16x16xf32, #tpu.memory_space<vmem>>, %arg11: memref<16x1xf32, #tpu.memory_space<vmem>>, %arg12: memref<16x1xf32, #tpu.memory_space<vmem>>, %arg13: memref<1x16x128xf32, #tpu.memory_space<vmem>>) attributes {dimension_semantics = [#tpu.dimension_semantics<parallel>, #tpu.dimension_semantics<parallel>], iteration_bounds = array<i64: 2, 1>, scalar_prefetch = 0 : i64, scratch_operands = 0 : i64, tpu.core_type = #tpu.core_type<tc>, window_params = [{transform_indices = @transform_0, window_bounds = array<i64: 1, 8, 16, 128>}, {transform_indices = @transform_1, window_bounds = array<i64: 1, 288, 1>}, {pipeline_mode = #tpu.pipeline_mode<synchronous>, transform_indices = @transform_2, window_bounds = array<i64: 288, 128>}, {pipeline_mode = #tpu.pipeline_mode<synchronous>, transform_indices = @transform_3, window_bounds = array<i64: 256, 32>}, {pipeline_mode = #tpu.pipeline_mode<synchronous>, transform_indices = @transform_4, window_bounds = array<i64: 32, 4>}, {pipeline_mode = #tpu.pipeline_mode<synchronous>, transform_indices = @transform_5, window_bounds = array<i64: 16, 16>}, {pipeline_mode = #tpu.pipeline_mode<synchronous>, transform_indices = @transform_6, window_bounds = array<i64: 16, 32>}, {pipeline_mode = #tpu.pipeline_mode<synchronous>, transform_indices = @transform_7, window_bounds = array<i64: 16, 1>}, {pipeline_mode = #tpu.pipeline_mode<synchronous>, transform_indices = @transform_8, window_bounds = array<i64: 16, 16>}, {pipeline_mode = #tpu.pipeline_mode<synchronous>, transform_indices = @transform_9, window_bounds = array<i64: 16, 1>}, {pipeline_mode = #tpu.pipeline_mode<synchronous>, transform_indices = @transform_10, window_bounds = array<i64: 16, 1>}, {transform_indices = @transform_11, window_bounds = array<i64: 1, 16, 128>}]} {
    %c0 = arith.constant 0 : index
    %c0_0 = arith.constant 0 : index
    %c0_1 = arith.constant 0 : index
    %c0_2 = arith.constant 0 : index
    %0 = vector.load %arg2[%c0, %c0_0, %c0_1, %c0_2] : memref<1x8x16x128xf32, #tpu.memory_space<vmem>>, vector<1x8x16x128xf32>
    %1 = vector.shape_cast %0 : vector<1x8x16x128xf32> to vector<8x16x128xf32>
    %cst = arith.constant dense<0.000000e+00> : vector<16x128xf32>
    %2 = vector.multi_reduction <add>, %1, %cst [0] : vector<8x16x128xf32> to vector<16x128xf32>
    %c0_3 = arith.constant 0 : index
    %c0_4 = arith.constant 0 : index
    %3 = vector.load %arg7[%c0_3, %c0_4] : memref<16x16xf32, #tpu.memory_space<vmem>>, vector<16x16xf32>
    %cst_5 = arith.constant dense<0.000000e+00> : vector<16x128xf32>
    %4 = tpu.matmul %3, %2, %cst_5 {dimension_numbers = #tpu.dot_dimension_numbers<[1], [0], [0], [1], [0, 0, 1, 1], [], []>} : vector<16x16xf32>, vector<16x128xf32>, vector<16x128xf32> -> vector<16x128xf32>
    %5 = vector.shape_cast %4 : vector<16x128xf32> to vector<1x16x128xf32>
    %6 = vector.broadcast %5 : vector<1x16x128xf32> to vector<8x16x128xf32>
    %7 = arith.subf %1, %6 : vector<8x16x128xf32>
    %8 = arith.mulf %7, %7 : vector<8x16x128xf32>
    %cst_6 = arith.constant dense<0.000000e+00> : vector<16x128xf32>
    %9 = vector.multi_reduction <add>, %8, %cst_6 [0] : vector<8x16x128xf32> to vector<16x128xf32>
    %c0_7 = arith.constant 0 : index
    %c0_8 = arith.constant 0 : index
    %10 = vector.load %arg7[%c0_7, %c0_8] : memref<16x16xf32, #tpu.memory_space<vmem>>, vector<16x16xf32>
    %cst_9 = arith.constant dense<0.000000e+00> : vector<16x128xf32>
    %11 = tpu.matmul %10, %9, %cst_9 {dimension_numbers = #tpu.dot_dimension_numbers<[1], [0], [0], [1], [0, 0, 1, 1], [], []>} : vector<16x16xf32>, vector<16x128xf32>, vector<16x128xf32> -> vector<16x128xf32>
    %cst_10 = arith.constant 9.99999974E-6 : f32
    %12 = vector.broadcast %cst_10 : f32 to vector<16x128xf32>
    %13 = arith.addf %11, %12 : vector<16x128xf32>
    %14 = math.rsqrt %13 : vector<16x128xf32>
    %15 = vector.shape_cast %14 : vector<16x128xf32> to vector<1x16x128xf32>
    %16 = vector.broadcast %15 : vector<1x16x128xf32> to vector<8x16x128xf32>
    %17 = arith.mulf %7, %16 : vector<8x16x128xf32>
    %18 = vector.shape_cast %17 : vector<8x16x128xf32> to vector<128x128xf32>
    %c0_11 = arith.constant 0 : index
    %c0_12 = arith.constant 0 : index
    %19 = vector.load %arg4[%c0_11, %c0_12] : memref<288x128xf32, #tpu.memory_space<vmem>>, vector<288x128xf32>
    %cst_13 = arith.constant dense<0.000000e+00> : vector<288x128xf32>
    %20 = tpu.matmul %19, %18, %cst_13 {dimension_numbers = #tpu.dot_dimension_numbers<[1], [0], [0], [1], [0, 0, 1, 1], [], []>} : vector<288x128xf32>, vector<128x128xf32>, vector<288x128xf32> -> vector<288x128xf32>
    %c0_14 = arith.constant 0 : index
    %c0_15 = arith.constant 0 : index
    %c0_16 = arith.constant 0 : index
    %21 = vector.load %arg3[%c0_14, %c0_15, %c0_16] : memref<1x288x1xf32, #tpu.memory_space<vmem>>, vector<1x288x1xf32>
    %22 = vector.shape_cast %21 : vector<1x288x1xf32> to vector<288x1xf32>
    %23 = vector.broadcast %22 : vector<288x1xf32> to vector<288x128xf32>
    %24 = arith.addf %20, %23 : vector<288x128xf32>
    %25 = vector.extract_strided_slice %24 {offsets = [0, 0], sizes = [32, 128], strides = [1, 1]} : vector<288x128xf32> to vector<32x128xf32>
    %26 = vector.extract_strided_slice %24 {offsets = [32, 0], sizes = [256, 128], strides = [1, 1]} : vector<288x128xf32> to vector<256x128xf32>
    %27 = vector.shape_cast %25 : vector<32x128xf32> to vector<4x8x128xf32>
    %cst_17 = arith.constant dense<0xFF800000> : vector<4x128xf32>
    %28 = vector.multi_reduction <maximumf>, %27, %cst_17 [1] : vector<4x8x128xf32> to vector<4x128xf32>
    %29 = vector.shape_cast %28 : vector<4x128xf32> to vector<4x1x128xf32>
    %30 = vector.broadcast %29 : vector<4x1x128xf32> to vector<4x8x128xf32>
    %31 = arith.subf %27, %30 : vector<4x8x128xf32>
    %32 = math.exp %31 : vector<4x8x128xf32>
    %cst_18 = arith.constant dense<0.000000e+00> : vector<4x128xf32>
    %33 = vector.multi_reduction <add>, %32, %cst_18 [1] : vector<4x8x128xf32> to vector<4x128xf32>
    %cst_19 = arith.constant 1.000000e+00 : f32
    %34 = vector.broadcast %cst_19 : f32 to vector<4x128xf32>
    %35 = arith.divf %34, %33 : vector<4x128xf32>
    %c0_20 = arith.constant 0 : index
    %c0_21 = arith.constant 0 : index
    %36 = vector.load %arg5[%c0_20, %c0_21] : memref<256x32xf32, #tpu.memory_space<vmem>>, vector<256x32xf32>
    %37 = vector.shape_cast %32 : vector<4x8x128xf32> to vector<32x128xf32>
    %cst_22 = arith.constant dense<0.000000e+00> : vector<256x128xf32>
    %38 = tpu.matmul %36, %37, %cst_22 {dimension_numbers = #tpu.dot_dimension_numbers<[1], [0], [0], [1], [0, 0, 1, 1], [], []>} : vector<256x32xf32>, vector<32x128xf32>, vector<256x128xf32> -> vector<256x128xf32>
    %39 = arith.mulf %38, %26 : vector<256x128xf32>
    %40 = vector.shape_cast %39 : vector<256x128xf32> to vector<8x32x128xf32>
    %cst_23 = arith.constant dense<0.000000e+00> : vector<32x128xf32>
    %41 = vector.multi_reduction <add>, %40, %cst_23 [0] : vector<8x32x128xf32> to vector<32x128xf32>
    %c0_24 = arith.constant 0 : index
    %c0_25 = arith.constant 0 : index
    %42 = vector.load %arg6[%c0_24, %c0_25] : memref<32x4xf32, #tpu.memory_space<vmem>>, vector<32x4xf32>
    %cst_26 = arith.constant dense<0.000000e+00> : vector<32x128xf32>
    %43 = tpu.matmul %42, %35, %cst_26 {dimension_numbers = #tpu.dot_dimension_numbers<[1], [0], [0], [1], [0, 0, 1, 1], [], []>} : vector<32x4xf32>, vector<4x128xf32>, vector<32x128xf32> -> vector<32x128xf32>
    %44 = arith.mulf %41, %43 : vector<32x128xf32>
    %c0_27 = arith.constant 0 : index
    %c0_28 = arith.constant 0 : index
    %45 = vector.load %arg8[%c0_27, %c0_28] : memref<16x32xf32, #tpu.memory_space<vmem>>, vector<16x32xf32>
    %cst_29 = arith.constant dense<0.000000e+00> : vector<16x128xf32>
    %46 = tpu.matmul %45, %44, %cst_29 {dimension_numbers = #tpu.dot_dimension_numbers<[1], [0], [0], [1], [0, 0, 1, 1], [], []>} : vector<16x32xf32>, vector<32x128xf32>, vector<16x128xf32> -> vector<16x128xf32>
    %c0_30 = arith.constant 0 : index
    %c0_31 = arith.constant 0 : index
    %47 = vector.load %arg9[%c0_30, %c0_31] : memref<16x1xf32, #tpu.memory_space<vmem>>, vector<16x1xf32>
    %48 = vector.broadcast %47 : vector<16x1xf32> to vector<16x128xf32>
    %49 = arith.addf %46, %48 : vector<16x128xf32>
    %cst_32 = arith.constant 0.000000e+00 : f32
    %50 = vector.broadcast %cst_32 : f32 to vector<16x128xf32>
    %51 = arith.maximumf %49, %50 : vector<16x128xf32>
    %c0_33 = arith.constant 0 : index
    %c0_34 = arith.constant 0 : index
    %52 = vector.load %arg10[%c0_33, %c0_34] : memref<16x16xf32, #tpu.memory_space<vmem>>, vector<16x16xf32>
    %cst_35 = arith.constant dense<0.000000e+00> : vector<16x128xf32>
    %53 = tpu.matmul %52, %51, %cst_35 {dimension_numbers = #tpu.dot_dimension_numbers<[1], [0], [0], [1], [0, 0, 1, 1], [], []>} : vector<16x16xf32>, vector<16x128xf32>, vector<16x128xf32> -> vector<16x128xf32>
    %54 = arith.subf %51, %53 : vector<16x128xf32>
    %c0_36 = arith.constant 0 : index
    %c0_37 = arith.constant 0 : index
    %55 = vector.load %arg10[%c0_36, %c0_37] : memref<16x16xf32, #tpu.memory_space<vmem>>, vector<16x16xf32>
    %56 = arith.mulf %54, %54 : vector<16x128xf32>
    %cst_38 = arith.constant dense<0.000000e+00> : vector<16x128xf32>
    %57 = tpu.matmul %55, %56, %cst_38 {dimension_numbers = #tpu.dot_dimension_numbers<[1], [0], [0], [1], [0, 0, 1, 1], [], []>} : vector<16x16xf32>, vector<16x128xf32>, vector<16x128xf32> -> vector<16x128xf32>
    %cst_39 = arith.constant 9.99999974E-6 : f32
    %58 = vector.broadcast %cst_39 : f32 to vector<16x128xf32>
    %59 = arith.addf %57, %58 : vector<16x128xf32>
    %60 = math.rsqrt %59 : vector<16x128xf32>
    %61 = arith.mulf %54, %60 : vector<16x128xf32>
    %c0_40 = arith.constant 0 : index
    %c0_41 = arith.constant 0 : index
    %62 = vector.load %arg11[%c0_40, %c0_41] : memref<16x1xf32, #tpu.memory_space<vmem>>, vector<16x1xf32>
    %63 = vector.broadcast %62 : vector<16x1xf32> to vector<16x128xf32>
    %64 = arith.mulf %61, %63 : vector<16x128xf32>
    %c0_42 = arith.constant 0 : index
    %c0_43 = arith.constant 0 : index
    %65 = vector.load %arg12[%c0_42, %c0_43] : memref<16x1xf32, #tpu.memory_space<vmem>>, vector<16x1xf32>
    %66 = vector.broadcast %65 : vector<16x1xf32> to vector<16x128xf32>
    %67 = arith.addf %64, %66 : vector<16x128xf32>
    %c0_44 = arith.constant 0 : index
    %c0_45 = arith.constant 0 : index
    %c0_46 = arith.constant 0 : index
    %68 = vector.load %arg13[%c0_44, %c0_45, %c0_46] : memref<1x16x128xf32, #tpu.memory_space<vmem>>, vector<1x16x128xf32>
    %69 = vector.shape_cast %68 : vector<1x16x128xf32> to vector<16x128xf32>
    %70 = vector.shape_cast %67 : vector<16x128xf32> to vector<1x16x128xf32>
    tpu.vector_store %arg13[%c0_44, %c0_45, %c0_46], %70 {strides = array<i32>} : memref<1x16x128xf32, #tpu.memory_space<vmem>>, vector<1x16x128xf32>,
    return
  }
  func.func @transform_0(%arg0: i32, %arg1: i32) -> (i32, i32, i32, i32) {
    %c0_i32 = arith.constant 0 : i32
    %c0_i32_0 = arith.constant 0 : i32
    %c0_i32_1 = arith.constant 0 : i32
    return %arg0, %c0_i32, %c0_i32_0, %arg1 : i32, i32, i32, i32
  }
  func.func @transform_1(%arg0: i32, %arg1: i32) -> (i32, i32, i32) {
    %c0_i32 = arith.constant 0 : i32
    %c0_i32_0 = arith.constant 0 : i32
    %c0_i32_1 = arith.constant 0 : i32
    return %arg0, %c0_i32, %c0_i32_0 : i32, i32, i32
  }
  func.func @transform_2(%arg0: i32, %arg1: i32) -> (i32, i32) {
    %c0_i32 = arith.constant 0 : i32
    %c0_i32_0 = arith.constant 0 : i32
    %c0_i32_1 = arith.constant 0 : i32
    return %c0_i32, %c0_i32_0 : i32, i32
  }
  func.func @transform_3(%arg0: i32, %arg1: i32) -> (i32, i32) {
    %c0_i32 = arith.constant 0 : i32
    %c0_i32_0 = arith.constant 0 : i32
    %c0_i32_1 = arith.constant 0 : i32
    return %c0_i32, %c0_i32_0 : i32, i32
  }
  func.func @transform_4(%arg0: i32, %arg1: i32) -> (i32, i32) {
    %c0_i32 = arith.constant 0 : i32
    %c0_i32_0 = arith.constant 0 : i32
    %c0_i32_1 = arith.constant 0 : i32
    return %c0_i32, %c0_i32_0 : i32, i32
  }
  func.func @transform_5(%arg0: i32, %arg1: i32) -> (i32, i32) {
    %c0_i32 = arith.constant 0 : i32
    %c0_i32_0 = arith.constant 0 : i32
    %c0_i32_1 = arith.constant 0 : i32
    return %c0_i32, %c0_i32_0 : i32, i32
  }
  func.func @transform_6(%arg0: i32, %arg1: i32) -> (i32, i32) {
    %c0_i32 = arith.constant 0 : i32
    %c0_i32_0 = arith.constant 0 : i32
    %c0_i32_1 = arith.constant 0 : i32
    return %c0_i32, %c0_i32_0 : i32, i32
  }
  func.func @transform_7(%arg0: i32, %arg1: i32) -> (i32, i32) {
    %c0_i32 = arith.constant 0 : i32
    %c0_i32_0 = arith.constant 0 : i32
    %c0_i32_1 = arith.constant 0 : i32
    return %c0_i32, %c0_i32_0 : i32, i32
  }
  func.func @transform_8(%arg0: i32, %arg1: i32) -> (i32, i32) {
    %c0_i32 = arith.constant 0 : i32
    %c0_i32_0 = arith.constant 0 : i32
    %c0_i32_1 = arith.constant 0 : i32
    return %c0_i32, %c0_i32_0 : i32, i32
  }
  func.func @transform_9(%arg0: i32, %arg1: i32) -> (i32, i32) {
    %c0_i32 = arith.constant 0 : i32
    %c0_i32_0 = arith.constant 0 : i32
    %c0_i32_1 = arith.constant 0 : i32
    return %c0_i32, %c0_i32_0 : i32, i32
  }
  func.func @transform_10(%arg0: i32, %arg1: i32) -> (i32, i32) {
    %c0_i32 = arith.constant 0 : i32
    %c0_i32_0 = arith.constant 0 : i32
    %c0_i32_1 = arith.constant 0 : i32
    return %c0_i32, %c0_i32_0 : i32, i32
  }
  func.func @transform_11(%arg0: i32, %arg1: i32) -> (i32, i32, i32) {
    %c0_i32 = arith.constant 0 : i32
    %c0_i32_0 = arith.constant 0 : i32
    return %arg0, %c0_i32, %arg1 : i32, i32, i32
  }
}

</mosaic_0001>

<bundles_post_ra>
// kernel: tpu_custom_call.1
= control target key start
LH: loop header
LB: loop body
LE: loop exit
PB: predicated region body
PF: predicated region fallthrough
CT: control target
= control target key end

     0   :  { %s3492_s0 = inlined_call_operand.vmem [shape: f32[2,8,16,128], index: 0, kind: input, shape index: {}]   ;;  %s3493_s1 = inlined_call_operand.vmem [shape: f32[2,288,1], index: 1, kind: input, shape index: {}]   ;;  %s3494_s2 = inlined_call_operand.vmem [shape: f32[288,128], index: 2, kind: input, shape index: {}]   ;;  %s3495_s3 = inlined_call_operand.vmem [shape: f32[256,32], index: 3, kind: input, shape index: {}]   ;;  %s3496_s4 = inlined_call_operand.vmem [shape: f32[32,4], index: 4, kind: input, shape index: {}]   ;;  %s3497_s5 = inlined_call_operand.vmem [shape: f32[16,16], index: 5, kind: input, shape index: {}]   ;;  %s3498_s6 = inlined_call_operand.vmem [shape: f32[16,32], index: 6, kind: input, shape index: {}]   ;;  %s3499_s7 = inlined_call_operand.vmem [shape: f32[16,1], index: 7, kind: input, shape index: {}]   ;;  %s3500_s8 = inlined_call_operand.vmem [shape: f32[16,16], index: 8, kind: input, shape index: {}]   ;;  %s3501_s9 = inlined_call_operand.vmem [shape: f32[16,1], index: 9, kind: input, shape index: {}]   ;;  %s3502_s10 = inlined_call_operand.vmem [shape: f32[16,1], index: 10, kind: input, shape index: {}]   ;;  %s3503_s11 = inlined_call_operand.hbm [shape: f32[2,16,128], index: 11, kind: output, shape index: {}]  }
   0x1   :  { %3504 = sst [smem:[#allocation29_spill]] %s3492_s0 }
   0x2   :  { %3505 = sst [smem:[#allocation30_spill]] %s3493_s1 }
   0x3   :  { %16 = vsyncpa [#allocation3], 0 }
   0x4   :  { %18 = vsyncpa [#allocation3 + $0x1], 0  ;;  %s2773_s17 = smov 0   ;;  %s2775_s18 = smov 0  }
   0x5   :  { %s2777_s19 = smov 0   ;;  %s2779_s20 = smov 0  }
   0x6   :  { %s2781_s21 = smov 0   ;;  %s2783_s22 = smov 0  }
   0x7 LB: > { %s2179_s23 = sadd.s32 4294967295, %s2707_s22   ;;  %s2180_s24 = sadd.s32 4294967294, %s2707_s22   ;;  %s2707_s22 = sphi %s2783_s22, %s24_s22   ;;  %s2703_s21 = sphi %s2781_s21, %s3562_s21   ;;  %s2699_s20 = sphi %s2779_s20, %s3561_s20   ;;  %s2695_s19 = sphi %s2777_s19, %s3560_s19   ;;  %s2691_s18 = sphi %s2775_s18, %s3559_s18   ;;  %s2687_s17 = sphi %s2773_s17, %s3558_s17  }
   0x8   : > { %s36_s25 = sadd.s32 1, %s2703_s21  ;;  %s288_s26 = sadd.s32 1, %s2695_s19 }
   0x9   : > { %p38_p0 = scmp.ge.s32.totalorder %s36_s25, 2  ;;  %p298_p1 = scmp.ne.s32.totalorder %s2695_s19, %s2691_s18 }
   0xa   : > { %p299_p2 = scmp.eq.s32.totalorder %s2179_s23, 1  ;;  %p304_p3 = scmp.ne.s32.totalorder %s2691_s18, %s2687_s17 }
   0xb   : > { %s3564_s25 = smov (%p38_p0, %s36_s25), 0  ;;  %p305_p5 = scmp.eq.s32.totalorder %s2180_s24, 1 }
   0xc   : > { %p2813_p4 = por %p299_p2, %p298_p1  ;;  %s283_s28 = ssub.s32 %s2703_s21, %s3564_s25 }
   0xd   : > { %p2183_p6 = scmp.ge.s32.totalorder %s2707_s22, 1  ;;  %p286_p7 = scmp.eq.s32.totalorder %s283_s28, 0 }
   0xe   : > { %p2820_p8 = por %p305_p5, %p304_p3  ;;  %p369_p9 = scmp.lt.s32.totalorder %s2707_s22, 3 }
   0xf   : > { %s2826_s30 = scalar_select %p286_p7, %s2695_s19, %s288_s26  }
  0x10   : > { %p370_p10 = pnand %p2183_p6, %p369_p9 }
  0x12   : > { %373 = sbr.rel (%p370_p10) target bundleno = 1648 (0x670), region = 64 }
  0x17   : > { %p417_p11 = scmp.lt.s32.totalorder %s2699_s20, 1  ;;  %v460_v0 = vld [vmem:[%s3497_s5] sm:$0xff]  ;;  %vm462_vm0 = vcmask 130048   ;;  %s3508_s0 = sld [smem:[#allocation29_spill]]  ;;  %v461_v31 = vld [vmem:[%s3497_s5 + $0x8] sm:$0xff]  ;;  %vm1280_vm1 = vcmask 261120  }
  0x18   : > { %2361 = vmatprep.mubr.msk.f32.mxu1 %vm462_vm0, %v460_v0  ;;  %s3509_s1 = sld [smem:[#allocation30_spill]]  ;;  %vm1670_vm2 = vcmask 1041409   ;;  %vm1672_vm3 = vcmask 1042434   ;;  %vm1674_vm4 = vcmask 1043459   ;;  %vm1689_vm5 = vcmask 1043456   ;;  %s2710_s26 = smov [#allocation2]  }
  0x19   : > { %s2834_s14 = scalar_select %p417_p11, %s2699_s20, 1  ;;  %vm1676_vm6 = vcmask 31744  }
  0x1b   : > { %s2240_s15 = sshll.u32 %s2834_s14, 7  ;;  %s2546_s12 = smul.u32 288, %s2834_s14 }
  0x1d   : > { %s424_s24 = scalar_lea.vmem %s3508_s0, %s2240_s15  ;;  %s414_s0 = sand.u32 1, %s2691_s18  }
  0x1e   : > { %v431_v1 = vld [vmem:[%s424_s24 + $0x8] sm:$0xff]  ;;  %v433_v2 = vld [vmem:[%s424_s24 + $0x18] sm:$0xff]  ;;  %v430_v6 = vld [vmem:[%s424_s24] sm:$0xff]  ;;  %s2914_s16 = scalar_lea.vmem %s3509_s1, %s2546_s12  ;;  %s2184_s28 = sshll.u32 %s414_s0, 4 }
  0x1f   : > { %v435_v3 = vld [vmem:[%s424_s24 + $0x28] sm:$0xff]  ;;  %v453_v4 = vadd.f32 %v433_v2, %v431_v1  ;;  %v437_v5 = vld [vmem:[%s424_s24 + $0x38] sm:$0xff]  ;;  %v432_v8 = vld [vmem:[%s424_s24 + $0x10] sm:$0xff]  ;;  %s2241_s12 = sshll.u32 %s2699_s20, 8  ;;  %s416_s13 = scalar_lea.vmem [#allocation2], %s2184_s28 }
  0x20   : > { %v434_v9 = vld [vmem:[%s424_s24 + $0x20] sm:$0xff]  ;;  %v439_v10 = vld [vmem:[%s424_s24 + $0x48] sm:$0xff]  ;;  %v446_v11 = vadd.f32 %v432_v8, %v430_v6  ;;  %v436_v13 = vld [vmem:[%s424_s24 + $0x30] sm:$0xff]  ;;  %s2089_s15 = sshll.u32 %s416_s13, 4  ;;  %s3447_s20 = scalar_lea.sflag [#allocation3], %s414_s0  ;;  %s3445_s15 = int_to_ptr.vmem [resolvable:$true] %s2089_s15 }
  0x21   : > { %v454_v7 = vadd.f32 %v453_v4, %v435_v3  ;;  %v441_v14 = vld [vmem:[%s424_s24 + $0x58] sm:$0xff]  ;;  %v438_v17 = vld [vmem:[%s424_s24 + $0x40] sm:$0xff]  ;;  %v443_v18 = vld [vmem:[%s424_s24 + $0x68] sm:$0xff]  ;;  %s2635_s28 = sshll.u32 %s2710_s26, 4  ;;  %s2636_s28 = int_to_ptr.vmem [resolvable:$false] %s2635_s28 }
  0x22   : > { %v447_v15 = vadd.f32 %v446_v11, %v434_v9  ;;  %v440_v21 = vld [vmem:[%s424_s24 + $0x50] sm:$0xff]  ;;  %v445_v22 = vld [vmem:[%s424_s24 + $0x78] sm:$0xff]  ;;  %v442_v25 = vld [vmem:[%s424_s24 + $0x60] sm:$0xff]  ;;  %p2638_p1 = scmp.lt.s32.totalorder %s3445_s15, %s2636_s28 }
  0x23   : > { %v455_v12 = vadd.f32 %v454_v7, %v437_v5  ;;  %v444_v28 = vld [vmem:[%s424_s24 + $0x70] sm:$0xff]  ;;  %s2631_s24 = scalar_lea.vmem %s3445_s15, 256 }
  0x24   : > { %v448_v19 = vadd.f32 %v447_v15, %v436_v13  ;;  %p2632_p12 = scmp.ne.s32.totalorder %s3445_s15, %s2631_s24 }
  0x25   : > { %v456_v16 = vadd.f32 %v455_v12, %v439_v10 }
  0x26   : > { %v449_v23 = vadd.f32 %v448_v19, %v438_v17  ;;  %v719_v19 = vld [vmem:[%s2914_s16] sm:$0xff]  ;;  %p2633_p13 = pnand %p2632_p12, %p2813_p4 }
  0x27   : > { %v457_v20 = vadd.f32 %v456_v16, %v441_v14  ;;  %v2709_v16 = vmov 0  }
  0x28   : > { %v450_v26 = vadd.f32 %v449_v23, %v440_v21  ;;  %2606 = vset.pattern.permute.xlu1 %v2709_v16  ;;  %2605 = vset.pattern.permute.xlu0 %v2709_v16  ;;  %v726_v23 = vld [vmem:[%s2914_s16 + $0x38] sm:$0xff]  ;;  %p2634_p0 = pneg %p2633_p13 }
  0x29   : > { %v458_v24 = vadd.f32 %v457_v20, %v443_v18  ;;  %v721_v20 = vld [vmem:[%s2914_s16 + $0x10] sm:$0xff] }
  0x2a   : > { %v451_v29 = vadd.f32 %v450_v26, %v442_v25  ;;  %v724_v26 = vld [vmem:[%s2914_s16 + $0x28] sm:$0xff] }
  0x2b   : > { %v459_v27 = vadd.f32 %v458_v24, %v445_v22  ;;  %v729_v24 = vld [vmem:[%s2914_s16 + $0x50] sm:$0xff] }
  0x2c   : > { %v452_v30 = vadd.f32 %v451_v29, %v444_v28  ;;  %v728_v29 = vld [vmem:[%s2914_s16 + $0x48] sm:$0xff] }
  0x2d   : > { %2357 = vmatprep.subr.mxu1 %v459_v27 }
  0x2e   : > { %2358 = vmatpush3.msra.mxu1 %v459_v27  ;;  %v734_v27 = vld [vmem:[%s2914_s16 + $0x78] sm:$0xff] }
  0x2f   : > { %2359 = vmatprep.subr.mxu1 %v452_v30 }
  0x30   : > { %2360 = vmatpush3.msra.mxu1 %v452_v30  ;;  %v723_v30 = vld [vmem:[%s2914_s16 + $0x20] sm:$0xff] }
  0x31   : > { %2362 = vmatmul.mubr.msk.f32.vlgmr.msra.gmra.mxu1 %vm462_vm0, %v461_v31 }
  0x32   : > { %2368 = vmatprep.mubr.msk.f32.mxu1 %vm462_vm0, %v460_v0 }
  0xf1   : > { %v2363_v32 = vpop.f32.mrf.mxu1 }
  0xf2   : > { %v2845_v33 = vsub.f32 %v431_v1, %v2363_v32  ;;  %v2847_v34 = vsub.f32 %v433_v2, %v2363_v32  ;;  %v2849_v35 = vsub.f32 %v435_v3, %v2363_v32  ;;  %v2851_v37 = vsub.f32 %v437_v5, %v2363_v32 }
  0xf3   : > { %v535_v36 = vpop.f32.mrf.mxu1  ;;  %v2861_v42 = vsub.f32 %v439_v10, %v2363_v32  ;;  %v2867_v46 = vsub.f32 %v441_v14, %v2363_v32  ;;  %v2877_v52 = vsub.f32 %v443_v18, %v2363_v32  ;;  %v2885_v58 = vsub.f32 %v445_v22, %v2363_v32  ;;  %v722_v18 = vld [vmem:[%s2914_s16 + $0x18] sm:$0xff]  ;;  %v683_v22 = vld [vmem:[%s3494_s2] sm:$0xff]  ;;  %v732_v32 = vld [vmem:[%s2914_s16 + $0x68] sm:$0xff] }
  0xf4   : > { %v2853_v38 = vsub.f32 %v430_v6, %v535_v36  ;;  %v2855_v39 = vsub.f32 %v432_v8, %v535_v36  ;;  %v561_v40 = vmul.f32 %v2845_v33, %v2845_v33  ;;  %v563_v41 = vmul.f32 %v2847_v34, %v2847_v34  ;;  %772 = vperm.xlu0 %2605, %v722_v18  }
  0xf5   : > { %v565_v43 = vmul.f32 %v2849_v35, %v2849_v35  ;;  %v2865_v45 = vsub.f32 %v434_v9, %v535_v36  ;;  %v567_v47 = vmul.f32 %v2851_v37, %v2851_v37  ;;  %v2871_v49 = vsub.f32 %v436_v13, %v535_v36  ;;  %2403 = vmatprep.mubr.f32.mxu0 %v683_v22 }
  0xf6   : > { %v583_v44 = vadd.f32 %v563_v41, %v561_v40  ;;  %v560_v50 = vmul.f32 %v2853_v38, %v2853_v38  ;;  %v562_v51 = vmul.f32 %v2855_v39, %v2855_v39  ;;  %v569_v53 = vmul.f32 %v2861_v42, %v2861_v42  ;;  %v742_v40 = vld [vmem:[%s2914_s16 + $0xb8] sm:$0xff]  ;;  %v737_v41 = vld [vmem:[%s2914_s16 + $0x90] sm:$0xff] }
  0xf7   : > { %v2881_v55 = vsub.f32 %v438_v17, %v535_v36  ;;  %v564_v56 = vmul.f32 %v2865_v45, %v2865_v45  ;;  %v571_v59 = vmul.f32 %v2867_v46, %v2867_v46  ;;  %v2889_v61 = vsub.f32 %v440_v21, %v535_v36  ;;  %v720_v17 = vld [vmem:[%s2914_s16 + $0x8] sm:$0xff]  ;;  %v730_v21 = vld [vmem:[%s2914_s16 + $0x58] sm:$0xff] }
  0xf8   : > { %v584_v48 = vadd.f32 %v583_v44, %v565_v43  ;;  %v576_v57 = vadd.f32 %v562_v51, %v560_v50  ;;  %v566_v62 = vmul.f32 %v2871_v49, %v2871_v49  ;;  %v573_v0 = vmul.f32 %v2877_v52, %v2877_v52  ;;  %762 = vperm.xlu1 %2606, %v720_v17   ;;  %v736_v43 = vld [vmem:[%s2914_s16 + $0x88] sm:$0xff]  ;;  %v731_v44 = vld [vmem:[%s2914_s16 + $0x60] sm:$0xff] }
  0xf9   : > { %v2895_v2 = vsub.f32 %v442_v25, %v535_v36  ;;  %v568_v3 = vmul.f32 %v2881_v55, %v2881_v55  ;;  %v575_v5 = vmul.f32 %v2885_v58, %v2885_v58  ;;  %v2901_v7 = vsub.f32 %v444_v28, %v535_v36  ;;  %767 = vperm.xlu0 %2605, %v721_v20   ;;  %v725_v25 = vld [vmem:[%s2914_s16 + $0x30] sm:$0xff]  ;;  %v727_v36 = vld [vmem:[%s2914_s16 + $0x40] sm:$0xff]  ;;  %v740_v50 = vld [vmem:[%s2914_s16 + $0xa8] sm:$0xff] }
  0xfa   : > { %v585_v54 = vadd.f32 %v584_v48, %v567_v47  ;;  %v577_v63 = vadd.f32 %v576_v57, %v564_v56  ;;  %v570_v8 = vmul.f32 %v2889_v61, %v2889_v61  ;;  %v733_v28 = vld [vmem:[%s2914_s16 + $0x70] sm:$0xff]  ;;  %v746_v47 = vld [vmem:[%s2914_s16 + $0xd8] sm:$0xff]  ;;  %v735_v51 = vld [vmem:[%s2914_s16 + $0x80] sm:$0xff] }
  0xfb   : > { %v572_v11 = vmul.f32 %v2895_v2, %v2895_v2  ;;  %v574_v13 = vmul.f32 %v2901_v7, %v2901_v7  ;;  %v741_v48 = vld [vmem:[%s2914_s16 + $0xb0] sm:$0xff]  ;;  %v744_v56 = vld [vmem:[%s2914_s16 + $0xc8] sm:$0xff]  ;;  %v739_v57 = vld [vmem:[%s2914_s16 + $0xa0] sm:$0xff] }
  0xfc   : > { %v586_v60 = vadd.f32 %v585_v54, %v569_v53  ;;  %v578_v4 = vadd.f32 %v577_v63, %v566_v62  ;;  %757 = vperm.xlu1 %2606, %v719_v19   ;;  %v750_v53 = vld [vmem:[%s2914_s16 + $0xf8] sm:$0xff]  ;;  %v745_v54 = vld [vmem:[%s2914_s16 + $0xd0] sm:$0xff]  ;;  %v748_v62 = vld [vmem:[%s2914_s16 + $0xe8] sm:$0xff] }
  0xfd   : > { %792 = vperm.xlu0 %2605, %v726_v23   ;;  %v743_v63 = vld [vmem:[%s2914_s16 + $0xc0] sm:$0xff]  ;;  %v689_v23 = vld [vmem:[%s3494_s2 + $0x30] sm:$0xff] }
  0xfe   : > { %v587_v1 = vadd.f32 %v586_v60, %v571_v59  ;;  %v579_v9 = vadd.f32 %v578_v4, %v568_v3  ;;  %v754_v59 = vld [vmem:[%s2914_s16 + $0x118] sm:$0xff]  ;;  %v749_v60 = vld [vmem:[%s2914_s16 + $0xf0] sm:$0xff]  ;;  %v751_v3 = vld [vmem:[%s2914_s16 + $0x100] sm:$0xff] }
  0xff   : > { %v752_v4 = vld [vmem:[%s2914_s16 + $0x108] sm:$0xff] }
 0x100   : > { %v588_v6 = vadd.f32 %v587_v1, %v573_v0  ;;  %v580_v12 = vadd.f32 %v579_v9, %v570_v8  ;;  %812 = vperm.xlu1 %2606, %v730_v21   ;;  %v747_v0 = vld [vmem:[%s2914_s16 + $0xe0] sm:$0xff]  ;;  %v753_v1 = vld [vmem:[%s2914_s16 + $0x110] sm:$0xff]  ;;  %v2045_v8 = vld [vmem:[%s3501_s9 + $0x8] sm:$0xff] }
 0x101   : > { %787 = vperm.xlu0 %2605, %v725_v25   ;;  %v2044_v9 = vld [vmem:[%s3501_s9] sm:$0xff] }
 0x102   : > { %v589_v10 = vadd.f32 %v588_v6, %v575_v5  ;;  %v581_v14 = vadd.f32 %v580_v12, %v572_v11  ;;  %v1783_v5 = vld [vmem:[%s3499_s7] sm:$0xff]  ;;  %v1784_v6 = vld [vmem:[%s3499_s7 + $0x8] sm:$0xff] }
 0x103   : > { %v2058_v11 = vld [vmem:[%s3502_s10] sm:$0xff] }
 0x104   : > { %2364 = vmatprep.subr.mxu1 %v589_v10  ;;  %v582_v15 = vadd.f32 %v581_v14, %v574_v13  ;;  %807 = vperm.xlu1 %2606, %v729_v24   ;;  %v690_v24 = vld [vmem:[%s3494_s2 + $0x38] sm:$0xff]  ;;  %v691_v25 = vld [vmem:[%s3494_s2 + $0x40] sm:$0xff] }
 0x105   : > { %2365 = vmatpush3.msra.mxu1 %v589_v10  ;;  %832 = vperm.xlu0 %2605, %v734_v27   ;;  %v2059_v10 = vld [vmem:[%s3502_s10 + $0x8] sm:$0xff]  ;;  %v693_v27 = vld [vmem:[%s3494_s2 + $0x50] sm:$0xff] }
 0x106   : > { %2366 = vmatprep.subr.mxu1 %v582_v15 }
 0x107   : > { %2367 = vmatpush3.msra.mxu1 %v582_v15 }
 0x108   : > { %2369 = vmatmul.mubr.msk.f32.vlgmr.msra.gmra.mxu1 %vm462_vm0, %v461_v31  ;;  %782 = vperm.xlu1 %2606, %v724_v26   ;;  %v738_v31 = vld [vmem:[%s2914_s16 + $0x98] sm:$0xff]  ;;  %v692_v26 = vld [vmem:[%s3494_s2 + $0x48] sm:$0xff]  ;;  %s3443_s16 = scalar_lea.hbm %s3503_s11, %s2241_s12  ;;  %s2637_s12 = scalar_lea.vmem %s2636_s28, 512 }
 0x109   : > { %802 = vperm.xlu0 %2605, %v728_v29   ;;  %v695_v29 = vld [vmem:[%s3494_s2 + $0x60] sm:$0xff]  ;;  %p2639_p2 = scmp.lt.s32.totalorder %s2637_s12, %s2631_s24 }
 0x10b   : > { %p2640_p3 = por %p2639_p2, %p2638_p1 }
 0x10c   : > { %827 = vperm.xlu1 %2606, %v733_v28   ;;  %v694_v28 = vld [vmem:[%s3494_s2 + $0x58] sm:$0xff] }
 0x10d   : > { %852 = vperm.xlu0 %2605, %v738_v31   ;;  %v697_v31 = vld [vmem:[%s3494_s2 + $0x70] sm:$0xff]  ;;  %p2641_p5 = pnand %p2640_p3, %p2634_p0 }
 0x110   : > { %777 = vperm.xlu1 %2606, %v723_v30   ;;  %v696_v30 = vld [vmem:[%s3494_s2 + $0x68] sm:$0xff] }
 0x111   : > { %797 = vperm.xlu0 %2605, %v727_v36   ;;  %v699_v36 = vld [vmem:[%s3494_s2 + $0x80] sm:$0xff] }
 0x114   : > { %822 = vperm.xlu1 %2606, %v732_v32   ;;  %v698_v32 = vld [vmem:[%s3494_s2 + $0x78] sm:$0xff] }
 0x115   : > { %847 = vperm.xlu0 %2605, %v737_v41   ;;  %v701_v41 = vld [vmem:[%s3494_s2 + $0x90] sm:$0xff] }
 0x118   : > { %872 = vperm.xlu1 %2606, %v742_v40   ;;  %v700_v40 = vld [vmem:[%s3494_s2 + $0x88] sm:$0xff] }
 0x119   : > { %817 = vperm.xlu0 %2605, %v731_v44   ;;  %v703_v44 = vld [vmem:[%s3494_s2 + $0xa0] sm:$0xff] }
 0x11c   : > { %842 = vperm.xlu1 %2606, %v736_v43   ;;  %v702_v43 = vld [vmem:[%s3494_s2 + $0x98] sm:$0xff] }
 0x11d   : > { %867 = vperm.xlu0 %2605, %v741_v48   ;;  %v705_v48 = vld [vmem:[%s3494_s2 + $0xb0] sm:$0xff] }
 0x120   : > { %892 = vperm.xlu1 %2606, %v746_v47   ;;  %v704_v47 = vld [vmem:[%s3494_s2 + $0xa8] sm:$0xff] }
 0x121   : > { %837 = vperm.xlu0 %2605, %v735_v51   ;;  %v707_v51 = vld [vmem:[%s3494_s2 + $0xc0] sm:$0xff] }
 0x124   : > { %862 = vperm.xlu1 %2606, %v740_v50   ;;  %v706_v50 = vld [vmem:[%s3494_s2 + $0xb8] sm:$0xff] }
 0x125   : > { %887 = vperm.xlu0 %2605, %v745_v54   ;;  %v709_v54 = vld [vmem:[%s3494_s2 + $0xd0] sm:$0xff] }
 0x128   : > { %912 = vperm.xlu1 %2606, %v750_v53   ;;  %v708_v53 = vld [vmem:[%s3494_s2 + $0xc8] sm:$0xff] }
 0x129   : > { %857 = vperm.xlu0 %2605, %v739_v57   ;;  %v711_v57 = vld [vmem:[%s3494_s2 + $0xe0] sm:$0xff] }
 0x12c   : > { %882 = vperm.xlu1 %2606, %v744_v56   ;;  %v710_v56 = vld [vmem:[%s3494_s2 + $0xd8] sm:$0xff] }
 0x12d   : > { %907 = vperm.xlu0 %2605, %v749_v60   ;;  %v713_v60 = vld [vmem:[%s3494_s2 + $0xf0] sm:$0xff] }
 0x130   : > { %932 = vperm.xlu1 %2606, %v754_v59   ;;  %v712_v59 = vld [vmem:[%s3494_s2 + $0xe8] sm:$0xff] }
 0x131   : > { %877 = vperm.xlu0 %2605, %v743_v63   ;;  %v715_v63 = vld [vmem:[%s3494_s2 + $0x100] sm:$0xff] }
 0x134   : > { %902 = vperm.xlu1 %2606, %v748_v62   ;;  %v714_v62 = vld [vmem:[%s3494_s2 + $0xf8] sm:$0xff] }
 0x135   : > { %927 = vperm.xlu0 %2605, %v753_v1   ;;  %v717_v1 = vld [vmem:[%s3494_s2 + $0x110] sm:$0xff] }
 0x138   : > { %897 = vperm.xlu1 %2606, %v747_v0   ;;  %v716_v0 = vld [vmem:[%s3494_s2 + $0x108] sm:$0xff] }
 0x139   : > { %922 = vperm.xlu0 %2605, %v752_v4   ;;  %v1248_v4 = vld [vmem:[%s3495_s3] sm:$0xff] }
 0x13a   : > { %2465 = vmatprep.mubr.msk.f32.mxu1 %vm1280_vm1, %v1248_v4  ;;  %v1250_v4 = vld [vmem:[%s3495_s3 + $0x10] sm:$0xff] }
 0x13c   : > { %917 = vperm.xlu1 %2606, %v751_v3   ;;  %v718_v3 = vld [vmem:[%s3494_s2 + $0x118] sm:$0xff] }
 0x13d   : > { %1792 = vperm.xlu0 %2605, %v1784_v6  }
 0x140   : > { %1787 = vperm.xlu1 %2606, %v1783_v5  }
 0x141   : > { %2048 = vperm.xlu0 %2605, %v2044_v9  }
 0x144   : > { %2053 = vperm.xlu1 %2606, %v2045_v8  }
 0x145   : > { %2062 = vperm.xlu0 %2605, %v2058_v11  }
 0x148   : > { %2067 = vperm.xlu1 %2606, %v2059_v10  }
 0x16f   : > { %v773_v6 = vpop.permute.xlu0 %772 }
 0x173   : > { %v763_v5 = vpop.permute.xlu1 %762 }
 0x177   : > { %v758_v10 = vpop.permute.xlu1 %757 }
 0x1c8   : > { %v2370_v12 = vpop.f32.mrf.mxu1 }
 0x1c9   : > { %v662_v13 = vadd.f32 1e-05, %v2370_v12 }
 0x1ca   : > { %v656_v14 = vpop.f32.mrf.mxu1 }
 0x1cb   : > { %2607 = vrsqrt.f32 %v662_v13  ;;  %v657_v15 = vadd.f32 1e-05, %v656_v14 }
 0x1cd   : > { %2609 = vrsqrt.f32 %v657_v15 }
 0x1d8   : > { %v2608_v16 = vpop.eup %2607 }
 0x1d9   : > { %v682_v17 = vmul.f32 %v2608_v16, %v2885_v58  ;;  %v680_v20 = vmul.f32 %v2608_v16, %v2877_v52  ;;  %v678_v22 = vmul.f32 %v2608_v16, %v2867_v46 }
 0x1da   : > { %v2610_v18 = vpop.eup %2609 }
 0x1db   : > { %2371 = vmatprep.subr.mxu0 %v682_v17  ;;  %v681_v19 = vmul.f32 %v2610_v18, %v2901_v7  ;;  %v679_v21 = vmul.f32 %v2610_v18, %v2895_v2  ;;  %v677_v58 = vmul.f32 %v2610_v18, %v2889_v61  ;;  %v676_v7 = vmul.f32 %v2608_v16, %v2861_v42 }
 0x1dc   : > { %2372 = vmatpush3.msra.mxu0 %v682_v17  ;;  %v675_v52 = vmul.f32 %v2610_v18, %v2881_v55  ;;  %v674_v2 = vmul.f32 %v2608_v16, %v2851_v37  ;;  %v673_v46 = vmul.f32 %v2610_v18, %v2871_v49  ;;  %v672_v61 = vmul.f32 %v2608_v16, %v2849_v35 }
 0x1dd   : > { %2373 = vmatprep.subr.mxu0 %v681_v19  ;;  %v671_v42 = vmul.f32 %v2610_v18, %v2865_v45  ;;  %v670_v55 = vmul.f32 %v2608_v16, %v2847_v34  ;;  %v669_v37 = vmul.f32 %v2610_v18, %v2855_v39  ;;  %v668_v49 = vmul.f32 %v2608_v16, %v2845_v33  ;;  %v684_v45 = vld [vmem:[%s3494_s2 + $0x8] sm:$0xff]  ;;  %v685_v34 = vld [vmem:[%s3494_s2 + $0x10] sm:$0xff]  ;;  %v686_v33 = vld [vmem:[%s3494_s2 + $0x18] sm:$0xff] }
 0x1de   : > { %2374 = vmatpush3.msra.mxu0 %v681_v19  ;;  %v667_v35 = vmul.f32 %v2610_v18, %v2853_v38  ;;  %v687_v38 = vld [vmem:[%s3494_s2 + $0x20] sm:$0xff]  ;;  %v688_v39 = vld [vmem:[%s3494_s2 + $0x28] sm:$0xff]  ;;  %v768_v18 = vpop.permute.xlu0 %767 }
 0x1df   : > { %2375 = vmatprep.subr.mxu0 %v680_v20 }
 0x1e0   : > { %2376 = vmatpush3.msra.mxu0 %v680_v20 }
 0x1e1   : > { %2377 = vmatprep.subr.mxu0 %v679_v21 }
 0x1e2   : > { %2378 = vmatpush3.msra.mxu0 %v679_v21 }
 0x1e3   : > { %2379 = vmatprep.subr.mxu0 %v678_v22 }
 0x1e4   : > { %2380 = vmatpush3.msra.mxu0 %v678_v22 }
 0x1e5   : > { %2381 = vmatprep.subr.mxu0 %v677_v58 }
 0x1e6   : > { %2382 = vmatpush3.msra.mxu0 %v677_v58 }
 0x1e7   : > { %2383 = vmatprep.subr.mxu0 %v676_v7 }
 0x1e8   : > { %2384 = vmatpush3.msra.mxu0 %v676_v7 }
 0x1e9   : > { %2385 = vmatprep.subr.mxu0 %v675_v52 }
 0x1ea   : > { %2386 = vmatpush3.msra.mxu0 %v675_v52 }
 0x1eb   : > { %2387 = vmatprep.subr.mxu0 %v674_v2 }
 0x1ec   : > { %2388 = vmatpush3.msra.mxu0 %v674_v2 }
 0x1ed   : > { %2389 = vmatprep.subr.mxu0 %v673_v46 }
 0x1ee   : > { %2390 = vmatpush3.msra.mxu0 %v673_v46 }
 0x1ef   : > { %2391 = vmatprep.subr.mxu0 %v672_v61 }
 0x1f0   : > { %2392 = vmatpush3.msra.mxu0 %v672_v61 }
 0x1f1   : > { %2393 = vmatprep.subr.mxu0 %v671_v42 }
 0x1f2   : > { %2394 = vmatpush3.msra.mxu0 %v671_v42 }
 0x1f3   : > { %2395 = vmatprep.subr.mxu0 %v670_v55 }
 0x1f4   : > { %2396 = vmatpush3.msra.mxu0 %v670_v55 }
 0x1f5   : > { %2397 = vmatprep.subr.mxu0 %v669_v37 }
 0x1f6   : > { %2398 = vmatpush3.msra.mxu0 %v669_v37 }
 0x1f7   : > { %2399 = vmatprep.subr.mxu0 %v668_v49 }
 0x1f8   : > { %2400 = vmatpush3.msra.mxu0 %v668_v49 }
 0x1f9   : > { %2401 = vmatprep.subr.mxu0 %v667_v35 }
 0x1fa   : > { %2402 = vmatpush3.msra.mxu0 %v667_v35 }
 0x1fb   : > { %2404 = vmatmul.mubr.f32.vlgmr.msra.gmra.mxu0 %v684_v45 }
 0x1fc   : > { %2406 = vmatprep.mubr.f32.mxu0 %v685_v34 }
 0x1ff   : > { %2407 = vmatmul.mubr.f32.gmra.mxu0 %v686_v33 }
 0x200   : > { %2409 = vmatprep.mubr.f32.mxu0 %v687_v38 }
 0x203   : > { %2410 = vmatmul.mubr.f32.gmra.mxu0 %v688_v39 }
 0x204   : > { %2412 = vmatprep.mubr.f32.mxu0 %v689_v23 }
 0x207   : > { %2413 = vmatmul.mubr.f32.gmra.mxu0 %v690_v24 }
 0x208   : > { %2415 = vmatprep.mubr.f32.mxu0 %v691_v25 }
 0x20b   : > { %2416 = vmatmul.mubr.f32.gmra.mxu0 %v692_v26 }
 0x20c   : > { %2418 = vmatprep.mubr.f32.mxu0 %v693_v27 }
 0x20f   : > { %2419 = vmatmul.mubr.f32.gmra.mxu0 %v694_v28 }
 0x210   : > { %2421 = vmatprep.mubr.f32.mxu0 %v695_v29 }
 0x213   : > { %2422 = vmatmul.mubr.f32.gmra.mxu0 %v696_v30 }
 0x214   : > { %2424 = vmatprep.mubr.f32.mxu0 %v697_v31 }
 0x217   : > { %2425 = vmatmul.mubr.f32.gmra.mxu0 %v698_v32 }
 0x218   : > { %2427 = vmatprep.mubr.f32.mxu0 %v699_v36 }
 0x21b   : > { %2428 = vmatmul.mubr.f32.gmra.mxu0 %v700_v40 }
 0x21c   : > { %2430 = vmatprep.mubr.f32.mxu0 %v701_v41 }
 0x21f   : > { %2431 = vmatmul.mubr.f32.gmra.mxu0 %v702_v43 }
 0x220   : > { %2433 = vmatprep.mubr.f32.mxu0 %v703_v44 }
 0x223   : > { %2434 = vmatmul.mubr.f32.gmra.mxu0 %v704_v47 }
 0x224   : > { %2436 = vmatprep.mubr.f32.mxu0 %v705_v48 }
 0x227   : > { %2437 = vmatmul.mubr.f32.gmra.mxu0 %v706_v50 }
 0x228   : > { %2439 = vmatprep.mubr.f32.mxu0 %v707_v51 }
 0x22b   : > { %2440 = vmatmul.mubr.f32.gmra.mxu0 %v708_v53 }
 0x22c   : > { %2442 = vmatprep.mubr.f32.mxu0 %v709_v54 }
 0x22f   : > { %2443 = vmatmul.mubr.f32.gmra.mxu0 %v710_v56 }
 0x230   : > { %2445 = vmatprep.mubr.f32.mxu0 %v711_v57 }
 0x233   : > { %2446 = vmatmul.mubr.f32.gmra.mxu0 %v712_v59 }
 0x234   : > { %2448 = vmatprep.mubr.f32.mxu0 %v713_v60 }
 0x237   : > { %2449 = vmatmul.mubr.f32.gmra.mxu0 %v714_v62 }
 0x238   : > { %2451 = vmatprep.mubr.f32.mxu0 %v715_v63 }
 0x23b   : > { %2452 = vmatmul.mubr.f32.gmra.mxu0 %v716_v0  ;;  %v1249_v0 = vld [vmem:[%s3495_s3 + $0x8] sm:$0xff] }
 0x23c   : > { %2454 = vmatprep.mubr.f32.mxu0 %v717_v1 }
 0x23f   : > { %2455 = vmatmul.mubr.f32.gmra.mxu0 %v718_v3 }
 0x2bb   : > { %v2405_v8 = vpop.f32.mrf.mxu0 }
 0x2bc   : > { %v1007_v9 = vadd.f32 %v2405_v8, %v763_v5 }
 0x2bd   : > { %v1001_v11 = vpop.f32.mrf.mxu0 }
 0x2be   : > { %v1186_v12 = vrot.slane %v1007_v9, 4  ;;  %v1002_v13 = vadd.f32 %v1001_v11, %v758_v10  ;;  %v1251_v11 = vld [vmem:[%s3495_s3 + $0x18] sm:$0xff] }
 0x2bf   : > { %v2408_v14 = vpop.f32.mrf.mxu0 }
 0x2c0   : > { %v1187_v15 = vmax.f32 %v1007_v9, %v1186_v12  ;;  %v1180_v16 = vrot.slane %v1002_v13, 4  ;;  %v1017_v17 = vadd.f32 %v2408_v14, %v773_v6  ;;  %v1252_v14 = vld [vmem:[%s3495_s3 + $0x20] sm:$0xff] }
 0x2c1   : > { %v1011_v19 = vpop.f32.mrf.mxu0 }
 0x2c2   : > { %v1188_v20 = vrot.slane %v1187_v15, 2  ;;  %v1181_v21 = vmax.f32 %v1002_v13, %v1180_v16  ;;  %v1198_v22 = vrot.slane %v1017_v17, 4  ;;  %v1012_v58 = vadd.f32 %v1011_v19, %v768_v18  ;;  %v1253_v18 = vld [vmem:[%s3495_s3 + $0x28] sm:$0xff]  ;;  %v1254_v19 = vld [vmem:[%s3495_s3 + $0x30] sm:$0xff] }
 0x2c4   : > { %v1189_v7 = vmax.f32 %v1187_v15, %v1188_v20  ;;  %v1182_v52 = vrot.slane %v1181_v21, 2  ;;  %v1199_v2 = vmax.f32 %v1017_v17, %v1198_v22  ;;  %v1192_v46 = vrot.slane %v1012_v58, 4  ;;  %v1255_v20 = vld [vmem:[%s3495_s3 + $0x38] sm:$0xff]  ;;  %v1257_v22 = vld [vmem:[%s3495_s3 + $0x48] sm:$0xff] }
 0x2c6   : > { %v1190_v61 = vrot.slane %v1189_v7, 1  ;;  %v1183_v42 = vmax.f32 %v1181_v21, %v1182_v52  ;;  %v1200_v55 = vrot.slane %v1199_v2, 2  ;;  %v1193_v37 = vmax.f32 %v1012_v58, %v1192_v46  ;;  %v1256_v21 = vld [vmem:[%s3495_s3 + $0x40] sm:$0xff]  ;;  %v1259_v52 = vld [vmem:[%s3495_s3 + $0x58] sm:$0xff] }
 0x2c7   : > { %v1260_v46 = vld [vmem:[%s3495_s3 + $0x60] sm:$0xff] }
 0x2c8   : > { %v1191_v49 = vmax.f32 %v1189_v7, %v1190_v61  ;;  %v1184_v35 = vrot.slane %v1183_v42, 1  ;;  %v1201_v45 = vmax.f32 %v1199_v2, %v1200_v55  ;;  %v1194_v34 = vrot.slane %v1193_v37, 2 }
 0x2ca   : > { %v1205_v33 = vsub.f32 %v1007_v9, %v1191_v49  ;;  %v1185_v38 = vmax.f32 %v1183_v42, %v1184_v35  ;;  %v1202_v39 = vrot.slane %v1201_v45, 1  ;;  %v1195_v23 = vmax.f32 %v1193_v37, %v1194_v34  ;;  %v1261_v35 = vld [vmem:[%s3495_s3 + $0x68] sm:$0xff]  ;;  %v1263_v34 = vld [vmem:[%s3495_s3 + $0x78] sm:$0xff] }
 0x2cc   : > { %v1210_v24 = vmul.f32 1.442695, %v1205_v33  ;;  %v1204_v25 = vsub.f32 %v1002_v13, %v1185_v38  ;;  %v1203_v26 = vmax.f32 %v1201_v45, %v1202_v39  ;;  %v1196_v27 = vrot.slane %v1195_v23, 1  ;;  %v1262_v45 = vld [vmem:[%s3495_s3 + $0x70] sm:$0xff]  ;;  %v1264_v33 = vld [vmem:[%s3495_s3 + $0x80] sm:$0xff]  ;;  %v1265_v38 = vld [vmem:[%s3495_s3 + $0x88] sm:$0xff] }
 0x2cd   : > { %v1266_v39 = vld [vmem:[%s3495_s3 + $0x90] sm:$0xff] }
 0x2ce   : > { %2611 = vpow2.f32 %v1210_v24  ;;  %v1208_v28 = vmul.f32 1.442695, %v1204_v25  ;;  %v1207_v29 = vsub.f32 %v1017_v17, %v1203_v26  ;;  %v1197_v30 = vmax.f32 %v1195_v23, %v1196_v27  ;;  %v1267_v23 = vld [vmem:[%s3495_s3 + $0x98] sm:$0xff]  ;;  %v1268_v24 = vld [vmem:[%s3495_s3 + $0xa0] sm:$0xff]  ;;  %v1269_v25 = vld [vmem:[%s3495_s3 + $0xa8] sm:$0xff] }
 0x2cf   : > { %v1270_v26 = vld [vmem:[%s3495_s3 + $0xb0] sm:$0xff]  ;;  %v1271_v27 = vld [vmem:[%s3495_s3 + $0xb8] sm:$0xff] }
 0x2d0   : > { %2613 = vpow2.f32 %v1208_v28  ;;  %v1214_v31 = vmul.f32 1.442695, %v1207_v29  ;;  %v1206_v32 = vsub.f32 %v1012_v58, %v1197_v30  ;;  %v1258_v58 = vld [vmem:[%s3495_s3 + $0x50] sm:$0xff]  ;;  %v1272_v28 = vld [vmem:[%s3495_s3 + $0xc0] sm:$0xff]  ;;  %v1273_v29 = vld [vmem:[%s3495_s3 + $0xc8] sm:$0xff] }
 0x2d1   : > { %v1274_v30 = vld [vmem:[%s3495_s3 + $0xd0] sm:$0xff] }
 0x2d2   : > { %2615 = vpow2.f32 %v1214_v31  ;;  %v1212_v36 = vmul.f32 1.442695, %v1206_v32  ;;  %v1275_v31 = vld [vmem:[%s3495_s3 + $0xd8] sm:$0xff]  ;;  %v1276_v32 = vld [vmem:[%s3495_s3 + $0xe0] sm:$0xff] }
 0x2d4   : > { %2617 = vpow2.f32 %v1212_v36  ;;  %v1277_v36 = vld [vmem:[%s3495_s3 + $0xe8] sm:$0xff] }
 0x2db   : > { %v2612_v40 = vpop.eup %2611 }
 0x2dc   : > { %v1222_v41 = vrot.slane %v2612_v40, 4 }
 0x2dd   : > { %v2614_v43 = vpop.eup %2613 }
 0x2de   : > { %v1216_v44 = vrot.slane %v2614_v43, 4  ;;  %v1223_v47 = vadd.f32 %v2612_v40, %v1222_v41  ;;  %v1279_v41 = vld [vmem:[%s3495_s3 + $0xf8] sm:$0xff] }
 0x2df   : > { %v2616_v48 = vpop.eup %2615 }
 0x2e0   : > { %2457 = vmatprep.subr.mxu1 %v2616_v48  ;;  %v1217_v50 = vadd.f32 %v2614_v43, %v1216_v44  ;;  %v1224_v51 = vrot.slane %v1223_v47, 2  ;;  %v1234_v53 = vrot.slane %v2616_v48, 4  ;;  %v1663_v44 = vld [vmem:[%s3496_s4 + $0x8] sm:$0xff] }
 0x2e1   : > { %v2618_v54 = vpop.eup %2617  ;;  %2458 = vmatpush3.msra.mxu1 %v2616_v48 }
 0x2e2   : > { %2459 = vmatprep.subr.mxu1 %v2618_v54  ;;  %v1218_v56 = vrot.slane %v1217_v50, 2  ;;  %v1225_v57 = vadd.f32 %v1224_v51, %v1223_v47  ;;  %v1228_v59 = vrot.slane %v2618_v54, 4  ;;  %v1235_v60 = vadd.f32 %v2616_v48, %v1234_v53  ;;  %v1664_v47 = vld [vmem:[%s3496_s4 + $0x10] sm:$0xff]  ;;  %v1665_v48 = vld [vmem:[%s3496_s4 + $0x18] sm:$0xff] }
 0x2e3   : > { %2460 = vmatpush3.msra.mxu1 %v2618_v54 }
 0x2e4   : > { %2461 = vmatprep.subr.mxu1 %v2612_v40  ;;  %v1219_v62 = vadd.f32 %v1218_v56, %v1217_v50  ;;  %v1229_v63 = vadd.f32 %v2618_v54, %v1228_v59  ;;  %v1226_v1 = vrot.slane %v1225_v57, 1  ;;  %v1236_v3 = vrot.slane %v1235_v60, 2  ;;  %v3234_v50 = vpop.f32.mrf.mxu0  ;;  %v1781_v59 = vld [vmem:[%s3498_s6] sm:$0xff] }
 0x2e5   : > { %2462 = vmatpush3.msra.mxu1 %v2612_v40  ;;  %v1278_v40 = vld [vmem:[%s3495_s3 + $0xf0] sm:$0xff] }
 0x2e6   : > { %2463 = vmatprep.subr.mxu1 %v2614_v43  ;;  %v1220_v5 = vrot.slane %v1219_v62, 1  ;;  %v1230_v6 = vrot.slane %v1229_v63, 2  ;;  %v1237_v8 = vadd.f32 %v1236_v3, %v1235_v60  ;;  %v1227_v12 = vadd.f32 %v1226_v1, %v1225_v57  ;;  %v3236_v51 = vpop.f32.mrf.mxu0  ;;  %v3258_v1 = vpop.permute.xlu1 %812 }
 0x2e7   : > { %2464 = vmatpush3.msra.mxu1 %v2614_v43  ;;  %v1662_v43 = vld [vmem:[%s3496_s4] sm:$0xff] }
 0x2e8   : > { %2466 = vmatmul.mubr.msk.f32.vlgmr.msra.gmra.mxu1 %vm1280_vm1, %v1249_v0  ;;  %v1221_v9 = vadd.f32 %v1220_v5, %v1219_v62  ;;  %v1231_v10 = vadd.f32 %v1230_v6, %v1229_v63  ;;  %v1238_v13 = vrot.slane %v1237_v8, 1  ;;  %v3238_v53 = vpop.f32.mrf.mxu0 }
 0x2e9   : > { %2468 = vmatprep.mubr.msk.f32.mxu1 %vm1280_vm1, %v1250_v4  ;;  %v3262_v4 = vpop.permute.xlu0 %792 }
 0x2ea   : > { %v1232_v15 = vrot.slane %v1231_v10, 1  ;;  %v1239_v16 = vadd.f32 %v1238_v13, %v1237_v8  ;;  %2619 = vrcp.f32 %v1221_v9  ;;  %v3240_v54 = vpop.f32.mrf.mxu0  ;;  %v3266_v6 = vpop.permute.xlu1 %807 }
 0x2eb   : > { %2621 = vrcp.f32 %v1227_v12 }
 0x2ec   : > { %2469 = vmatmul.mubr.msk.f32.gmra.mxu1 %vm1280_vm1, %v1251_v11  ;;  %v1233_v17 = vadd.f32 %v1232_v15, %v1231_v10  ;;  %v3242_v56 = vpop.f32.mrf.mxu0 }
 0x2ed   : > { %2471 = vmatprep.mubr.msk.f32.mxu1 %vm1280_vm1, %v1252_v14  ;;  %v3268_v8 = vpop.permute.xlu0 %787 }
 0x2ee   : > { %2623 = vrcp.f32 %v1233_v17  ;;  %v3244_v57 = vpop.f32.mrf.mxu0  ;;  %v3272_v10 = vpop.permute.xlu1 %782 }
 0x2ef   : > { %2625 = vrcp.f32 %v1239_v16 }
 0x2f0   : > { %2472 = vmatmul.mubr.msk.f32.gmra.mxu1 %vm1280_vm1, %v1253_v18  ;;  %v3250_v60 = vpop.f32.mrf.mxu0 }
 0x2f1   : > { %2474 = vmatprep.mubr.msk.f32.mxu1 %vm1280_vm1, %v1254_v19  ;;  %v3276_v12 = vpop.permute.xlu0 %832 }
 0x2f2   : > { %v3252_v62 = vpop.f32.mrf.mxu0  ;;  %v3280_v14 = vpop.permute.xlu1 %827 }
 0x2f4   : > { %2475 = vmatmul.mubr.msk.f32.gmra.mxu1 %vm1280_vm1, %v1255_v20  ;;  %v3254_v63 = vpop.f32.mrf.mxu0 }
 0x2f5   : > { %2477 = vmatprep.mubr.msk.f32.mxu1 %vm1280_vm1, %v1256_v21  ;;  %v3282_v15 = vpop.permute.xlu0 %802 }
 0x2f6   : > { %v3256_v0 = vpop.f32.mrf.mxu0  ;;  %v778_v17 = vpop.permute.xlu1 %777 }
 0x2f7   : > { %v2620_v7 = vpop.eup %2619 }
 0x2f8   : > { %2478 = vmatmul.mubr.msk.f32.gmra.mxu1 %vm1280_vm1, %v1257_v22  ;;  %v2622_v2 = vpop.eup %2621  ;;  %v3260_v3 = vpop.f32.mrf.mxu0 }
 0x2f9   : > { %2480 = vmatprep.mubr.msk.f32.mxu1 %vm1280_vm1, %v1258_v58  ;;  %v1671_v42 = vsel %vm1670_vm2, %v2622_v2, %v2620_v7  ;;  %v3288_v19 = vpop.permute.xlu0 %852 }
 0x2fa   : > { %v3264_v5 = vpop.f32.mrf.mxu0  ;;  %v823_v21 = vpop.permute.xlu1 %822 }
 0x2fb   : > { %v2624_v61 = vpop.eup %2623 }
 0x2fc   : > { %v2626_v55 = vpop.eup %2625  ;;  %2481 = vmatmul.mubr.msk.f32.gmra.mxu1 %vm1280_vm1, %v1259_v52  ;;  %v1673_v37 = vsel %vm1672_vm3, %v2624_v61, %v1671_v42  ;;  %v3270_v9 = vpop.f32.mrf.mxu0 }
 0x2fd   : > { %v1675_v49 = vsel %vm1674_vm4, %v2626_v55, %v1673_v37  ;;  %2483 = vmatprep.mubr.msk.f32.mxu1 %vm1280_vm1, %v1260_v46  ;;  %v798_v58 = vpop.permute.xlu0 %797 }
 0x2fe   : > { %2513 = vmatprep.subr.msk.mxu1 %vm1689_vm5, %v1675_v49  ;;  %v3274_v11 = vpop.f32.mrf.mxu0  ;;  %v3298_v2 = vpop.permute.xlu1 %872 }
 0x2ff   : > { %2514 = vmatpush3.msk.msra.mxu1 %vm1689_vm5, %v1675_v49 }
 0x300   : > { %2484 = vmatmul.mubr.msk.f32.gmra.mxu1 %vm1280_vm1, %v1261_v35  ;;  %v3278_v13 = vpop.f32.mrf.mxu0 }
 0x301   : > { %2486 = vmatprep.mubr.msk.f32.mxu1 %vm1280_vm1, %v1262_v45  ;;  %v848_v55 = vpop.permute.xlu0 %847 }
 0x302   : > { %v3284_v16 = vpop.f32.mrf.mxu0  ;;  %v843_v35 = vpop.permute.xlu1 %842 }
 0x304   : > { %2487 = vmatmul.mubr.msk.f32.gmra.mxu1 %vm1280_vm1, %v1263_v34  ;;  %v3286_v18 = vpop.f32.mrf.mxu0 }
 0x305   : > { %2489 = vmatprep.mubr.msk.f32.mxu1 %vm1280_vm1, %v1264_v33  ;;  %v818_v33 = vpop.permute.xlu0 %817 }
 0x306   : > { %v3290_v20 = vpop.f32.mrf.mxu0 }
 0x308   : > { %2490 = vmatmul.mubr.msk.f32.gmra.mxu1 %vm1280_vm1, %v1265_v38  ;;  %v3294_v7 = vpop.f32.mrf.mxu0 }
 0x309   : > { %2492 = vmatprep.mubr.msk.f32.mxu1 %vm1280_vm1, %v1266_v39 }
 0x30a   : > { %v3302_v61 = vpop.f32.mrf.mxu0 }
 0x30c   : > { %2493 = vmatmul.mubr.msk.f32.gmra.mxu1 %vm1280_vm1, %v1267_v23  ;;  %v3308_v49 = vpop.f32.mrf.mxu0  ;;  %v3318_v23 = vpop.permute.xlu1 %892 }
 0x30d   : > { %2495 = vmatprep.mubr.msk.f32.mxu1 %vm1280_vm1, %v1268_v24  ;;  %3517 = vst [vmem:[#allocation12_spill] sm:$0xff] %v3318_v23 }
 0x30e   : > { %v3314_v38 = vpop.f32.mrf.mxu0 }
 0x310   : > { %2496 = vmatmul.mubr.msk.f32.gmra.mxu1 %vm1280_vm1, %v1269_v25  ;;  %v2444_v25 = vpop.f32.mrf.mxu0 }
 0x311   : > { %2498 = vmatprep.mubr.msk.f32.mxu1 %vm1280_vm1, %v1270_v26 }
 0x314   : > { %2499 = vmatmul.mubr.msk.f32.gmra.mxu1 %vm1280_vm1, %v1271_v27  ;;  %v868_v27 = vpop.permute.xlu0 %867 }
 0x315   : > { %2501 = vmatprep.mubr.msk.f32.mxu1 %vm1280_vm1, %v1272_v28 }
 0x318   : > { %2502 = vmatmul.mubr.msk.f32.gmra.mxu1 %vm1280_vm1, %v1273_v29  ;;  %v1131_v29 = vpop.f32.mrf.mxu0 }
 0x319   : > { %2504 = vmatprep.mubr.msk.f32.mxu1 %vm1280_vm1, %v1274_v30  ;;  %v863_v30 = vpop.permute.xlu1 %862 }
 0x31c   : > { %2505 = vmatmul.mubr.msk.f32.gmra.mxu1 %vm1280_vm1, %v1275_v31 }
 0x31d   : > { %2507 = vmatprep.mubr.msk.f32.mxu1 %vm1280_vm1, %v1276_v32 }
 0x320   : > { %2508 = vmatmul.mubr.msk.f32.gmra.mxu1 %vm1280_vm1, %v1277_v36  ;;  %v838_v36 = vpop.permute.xlu0 %837 }
 0x321   : > { %2510 = vmatprep.mubr.msk.f32.mxu1 %vm1280_vm1, %v1278_v40  ;;  %v2447_v40 = vpop.f32.mrf.mxu0 }
 0x324   : > { %2511 = vmatmul.mubr.msk.f32.gmra.mxu1 %vm1280_vm1, %v1279_v41 }
 0x325   : > { %2515 = vmatprep.mubr.msk.f32.mxu1 %vm1676_vm6, %v1662_v43  ;;  %v913_v43 = vpop.permute.xlu1 %912 }
 0x328   : > { %2516 = vmatmul.mubr.msk.f32.vlgmr.msra.gmra.mxu1 %vm1676_vm6, %v1663_v44 }
 0x329   : > { %2518 = vmatprep.mubr.msk.f32.mxu1 %vm1676_vm6, %v1664_v47  ;;  %v1141_v47 = vpop.f32.mrf.mxu0 }
 0x32c   : > { %2519 = vmatmul.mubr.msk.f32.gmra.mxu1 %vm1676_vm6, %v1665_v48 }
 0x32d   : > { %2529 = vmatprep.mubr.msk.f32.mxu1 %vm1280_vm1, %v1781_v59  ;;  %v888_v59 = vpop.permute.xlu0 %887 }
 0x3a8   : > { %v3292_v22 = vpop.f32.mrf.mxu1 }
 0x3a9   : > { %3510 = vst [vmem:[#allocation5_spill] sm:$0xff] %v3292_v22 }
 0x3aa   : > { %v3296_v52 = vpop.f32.mrf.mxu1 }
 0x3ab   : > { %3511 = vst [vmem:[#allocation6_spill] sm:$0xff] %v3296_v52  ;;  %v2450_v52 = vpop.f32.mrf.mxu0 }
 0x3ac   : > { %v3300_v46 = vpop.f32.mrf.mxu1 }
 0x3ad   : > { %3512 = vst [vmem:[#allocation7_spill] sm:$0xff] %v3300_v46 }
 0x3ae   : > { %v3304_v42 = vpop.f32.mrf.mxu1 }
 0x3af   : > { %3513 = vst [vmem:[#allocation8_spill] sm:$0xff] %v3304_v42 }
 0x3b0   : > { %v3306_v37 = vpop.f32.mrf.mxu1 }
 0x3b1   : > { %3514 = vst [vmem:[#allocation9_spill] sm:$0xff] %v3306_v37 }
 0x3b2   : > { %v3310_v45 = vpop.f32.mrf.mxu1 }
 0x3b3   : > { %3515 = vst [vmem:[#allocation10_spill] sm:$0xff] %v3310_v45 }
 0x3b4   : > { %v3312_v34 = vpop.f32.mrf.mxu1 }
 0x3b6   : > { %v3316_v39 = vpop.f32.mrf.mxu1 }
 0x3b7   : > { %3516 = vst [vmem:[#allocation11_spill] sm:$0xff] %v3316_v39 }
 0x3b8   : > { %v3320_v24 = vpop.f32.mrf.mxu1 }
 0x3b9   : > { %3518 = vst [vmem:[#allocation13_spill] sm:$0xff] %v3320_v24  ;;  %v883_v24 = vpop.permute.xlu1 %882 }
 0x3ba   : > { %v3322_v26 = vpop.f32.mrf.mxu1 }
 0x3bb   : > { %3519 = vst [vmem:[#allocation14_spill] sm:$0xff] %v3322_v26 }
 0x3bc   : > { %v3324_v28 = vpop.f32.mrf.mxu1 }
 0x3bd   : > { %3520 = vst [vmem:[#allocation15_spill] sm:$0xff] %v3324_v28 }
 0x3be   : > { %v3326_v31 = vpop.f32.mrf.mxu1 }
 0x3bf   : > { %3521 = vst [vmem:[#allocation16_spill] sm:$0xff] %v3326_v31  ;;  %v1151_v31 = vpop.f32.mrf.mxu0 }
 0x3c0   : > { %v3328_v32 = vpop.f32.mrf.mxu1 }
 0x3c1   : > { %3522 = vst [vmem:[#allocation17_spill] sm:$0xff] %v3328_v32  ;;  %v858_v32 = vpop.permute.xlu0 %857 }
 0x3c2   : > { %v3330_v41 = vpop.f32.mrf.mxu1 }
 0x3c3   : > { %3523 = vst [vmem:[#allocation18_spill] sm:$0xff] %v3330_v41  ;;  %v933_v41 = vpop.permute.xlu1 %932 }
 0x3c4   : > { %v3332_v44 = vpop.f32.mrf.mxu1 }
 0x3c5   : > { %3524 = vst [vmem:[#allocation19_spill] sm:$0xff] %v3332_v44  ;;  %v3346_v44 = vpop.f32.mrf.mxu0 }
 0x3c6   : > { %v3334_v48 = vpop.f32.mrf.mxu1  ;;  %3530 = vst [vmem:[#allocation25_spill] sm:$0xff] %v3346_v44  ;;  %v1032_v44 = vadd.f32 %v3240_v54, %v3268_v8  ;;  %v1077_v54 = vadd.f32 %v3260_v3, %v3276_v12  ;;  %v1117_v3 = vadd.f32 %v3294_v7, %v3298_v2  ;;  %v1127_v8 = vadd.f32 %v3308_v49, %v883_v24  ;;  %v3536_v7 = vld [vmem:[#allocation11_spill] sm:$0xff] }
 0x3c7   : > { %3525 = vst [vmem:[#allocation20_spill] sm:$0xff] %v3334_v48  ;;  %v908_v48 = vpop.permute.xlu0 %907  ;;  %v903_v46 = vpop.permute.xlu1 %902  ;;  %v1157_v49 = vadd.f32 %v2450_v52, %v913_v43 }
 0x3c8   : > { %v3336_v26 = vpop.f32.mrf.mxu1 }
 0x3c9   : > { %3526 = vst [vmem:[#allocation21_spill] sm:$0xff] %v3336_v26  ;;  %v3352_v26 = vpop.f32.mrf.mxu0 }
 0x3ca   : > { %v3338_v45 = vpop.f32.mrf.mxu1  ;;  %3533 = vst [vmem:[#allocation28_spill] sm:$0xff] %v3352_v26  ;;  %v1057_v26 = vadd.f32 %v3250_v60, %v3258_v1  ;;  %v1082_v60 = vadd.f32 %v3274_v11, %v838_v36 }
 0x3cb   : > { %3527 = vst [vmem:[#allocation22_spill] sm:$0xff] %v3338_v45  ;;  %v1027_v45 = vadd.f32 %v3234_v50, %v3272_v10  ;;  %v1052_v50 = vadd.f32 %v3252_v62, %v3266_v6  ;;  %v1062_v10 = vadd.f32 %v3256_v0, %v818_v33  ;;  %v2456_v1 = vpop.f32.mrf.mxu0  ;;  %v1097_v62 = vadd.f32 %v3278_v13, %v3288_v19  ;;  %v898_v11 = vpop.permute.xlu1 %897  ;;  %v3534_v13 = vld [vmem:[#allocation12_spill] sm:$0xff]  ;;  %v3538_v33 = vld [vmem:[#allocation9_spill] sm:$0xff] }
 0x3cc   : > { %v3340_v22 = vpop.f32.mrf.mxu1  ;;  %v1107_v0 = vadd.f32 %v3286_v18, %v863_v30  ;;  %v3394_v19 = vadd.f32 %v1141_v47, %v898_v11 }
 0x3cd   : > { %3528 = vst [vmem:[#allocation23_spill] sm:$0xff] %v3340_v22  ;;  %v1022_v22 = vadd.f32 %v3236_v51, %v778_v17  ;;  %v1067_v51 = vadd.f32 %v3254_v63, %v823_v21  ;;  %v1092_v63 = vadd.f32 %v3284_v16, %v848_v55  ;;  %v1147_v16 = vadd.f32 %v2447_v40, %v903_v46  ;;  %v3535_v21 = vld [vmem:[#allocation7_spill] sm:$0xff] }
 0x3ce   : > { %v3342_v42 = vpop.f32.mrf.mxu1  ;;  %v1608_v2 = vmul.f32 %v3536_v7, %v1052_v50 }
 0x3d0   : > { %v3344_v37 = vpop.f32.mrf.mxu1 }
 0x3d1   : > { %3529 = vst [vmem:[#allocation24_spill] sm:$0xff] %v3344_v37  ;;  %v1037_v37 = vadd.f32 %v3238_v53, %v3262_v4  ;;  %v878_v53 = vpop.permute.xlu0 %877  ;;  %v1102_v4 = vadd.f32 %v3290_v20, %v858_v32  ;;  %v1171_v20 = vpop.f32.mrf.mxu0  ;;  %v3541_v32 = vld [vmem:[#allocation19_spill] sm:$0xff] }
 0x3d2   : > { %v3348_v28 = vpop.f32.mrf.mxu1  ;;  %v1122_v12 = vadd.f32 %v3314_v38, %v878_v53  ;;  %v1617_v36 = vmul.f32 %v3541_v32, %v1097_v62  ;;  %v3544_v53 = vld [vmem:[#allocation13_spill] sm:$0xff] }
 0x3d3   : > { %3531 = vst [vmem:[#allocation26_spill] sm:$0xff] %v3348_v28  ;;  %v1047_v28 = vadd.f32 %v3242_v56, %v3282_v15  ;;  %v1072_v56 = vadd.f32 %v3264_v5, %v3280_v14  ;;  %v1112_v5 = vadd.f32 %v3302_v61, %v868_v27  ;;  %v1137_v14 = vadd.f32 %v2444_v25, %v3534_v13  ;;  %v3537_v61 = vld [vmem:[#allocation15_spill] sm:$0xff]  ;;  %v3539_v25 = vld [vmem:[#allocation8_spill] sm:$0xff]  ;;  %v3549_v62 = vld [vmem:[#allocation17_spill] sm:$0xff] }
 0x3d4   : > { %v3350_v39 = vpop.f32.mrf.mxu1  ;;  %v1132_v15 = vadd.f32 %v1131_v29, %v888_v59  ;;  %v1613_v55 = vmul.f32 %v3537_v61, %v1077_v54  ;;  %v1604_v27 = vmul.f32 %v3539_v25, %v1032_v44  ;;  %v3540_v29 = vld [vmem:[#allocation16_spill] sm:$0xff]  ;;  %v3543_v59 = vld [vmem:[#allocation10_spill] sm:$0xff]  ;;  %v1611_v52 = vmul.f32 %v3544_v53, %v1067_v51  ;;  %v3546_v54 = vld [vmem:[#allocation23_spill] sm:$0xff] }
 0x3d5   : > { %3532 = vst [vmem:[#allocation27_spill] sm:$0xff] %v3350_v39  ;;  %v1042_v39 = vadd.f32 %v3244_v57, %v798_v58  ;;  %v1087_v57 = vadd.f32 %v3270_v9, %v843_v35  ;;  %v1609_v9 = vmul.f32 %v3312_v34, %v1057_v26  ;;  %v1605_v58 = vmul.f32 %v3535_v21, %v1037_v37  ;;  %v928_v26 = vpop.permute.xlu0 %927  ;;  %v3542_v37 = vld [vmem:[#allocation5_spill] sm:$0xff]  ;;  %v3547_v44 = vld [vmem:[#allocation6_spill] sm:$0xff] }
 0x3d6   : > { %v3357_v23 = vpop.f32.mrf.mxu1  ;;  %v1152_v35 = vadd.f32 %v1151_v31, %v908_v48  ;;  %v1177_v34 = vadd.f32 %v2456_v1, %v933_v41  ;;  %v1607_v24 = vmul.f32 %v3538_v33, %v1047_v28  ;;  %v1612_v30 = vmul.f32 %v3540_v29, %v1072_v56  ;;  %v3545_v28 = vld [vmem:[#allocation20_spill] sm:$0xff]  ;;  %v3548_v56 = vld [vmem:[#allocation14_spill] sm:$0xff]  ;;  %v3552_v33 = vld [vmem:[#allocation21_spill] sm:$0xff] }
 0x3d7   : > { %v1655_v46 = vadd.f32 %v1609_v9, %v1605_v58  ;;  %v1172_v40 = vadd.f32 %v1171_v20, %v928_v26  ;;  %v1603_v47 = vmul.f32 %v3542_v37, %v1027_v45  ;;  %v1606_v50 = vmul.f32 %v3543_v59, %v1042_v39 }
 0x3d8   : > { %v3372_v17 = vpop.f32.mrf.mxu1  ;;  %v1648_v41 = vadd.f32 %v1608_v2, %v1604_v27  ;;  %v1616_v48 = vmul.f32 %v3545_v28, %v1092_v63  ;;  %v1621_v1 = vmul.f32 %v3546_v54, %v1117_v3  ;;  %v1602_v9 = vmul.f32 %v3547_v44, %v1022_v22 }
 0x3d9   : > { %v1656_v43 = vadd.f32 %v1655_v46, %v1613_v55  ;;  %v1641_v11 = vadd.f32 %v1607_v24, %v1603_v47  ;;  %v1610_v13 = vmul.f32 %v3548_v56, %v1062_v10  ;;  %v1615_v20 = vmul.f32 %v3549_v62, %v1087_v57  ;;  %v3551_v55 = vld [vmem:[#allocation18_spill] sm:$0xff]  ;;  %v3555_v47 = vld [vmem:[#allocation25_spill] sm:$0xff] }
 0x3da   : > { %v3385_v6 = vpop.f32.mrf.mxu1  ;;  %v1649_v45 = vadd.f32 %v1648_v41, %v1612_v30  ;;  %v1620_v39 = vmul.f32 %v3342_v42, %v1112_v5  ;;  %v1634_v2 = vadd.f32 %v1606_v50, %v1602_v9  ;;  %v1614_v63 = vmul.f32 %v3551_v55, %v1082_v60  ;;  %v3553_v46 = vld [vmem:[#allocation22_spill] sm:$0xff]  ;;  %v3554_v30 = vld [vmem:[#allocation24_spill] sm:$0xff] }
 0x3db   : > { %v1657_v58 = vadd.f32 %v1656_v43, %v1617_v36  ;;  %v1642_v61 = vadd.f32 %v1641_v11, %v1611_v52  ;;  %v1619_v3 = vmul.f32 %v3552_v33, %v1107_v0  ;;  %v1624_v10 = vmul.f32 %v3357_v23, %v1132_v15  ;;  %v3556_v53 = vld [vmem:[#allocation26_spill] sm:$0xff]  ;;  %v918_v15 = vpop.permute.xlu1 %917 }
 0x3dc   : > { %v2506_v18 = vpop.f32.mrf.mxu1  ;;  %v3550_v51 = vld [vmem:[#allocation27_spill] sm:$0xff]  ;;  %v1650_v22 = vadd.f32 %v1649_v45, %v1616_v48  ;;  %v1635_v57 = vadd.f32 %v1634_v2, %v1610_v13  ;;  %v1618_v29 = vmul.f32 %v3553_v46, %v1102_v4  ;;  %v1623_v42 = vmul.f32 %v3554_v30, %v1127_v8  ;;  %v3557_v8 = vld [vmem:[#allocation28_spill] sm:$0xff] }
 0x3dd   : > { %v1625_v7 = vmul.f32 %v3550_v51, %v1137_v14  ;;  %v1658_v24 = vadd.f32 %v1657_v58, %v1621_v1  ;;  %v1629_v25 = vmul.f32 %v2506_v18, %v1157_v49  ;;  %v1643_v27 = vadd.f32 %v1642_v61, %v1615_v20  ;;  %v923_v14 = vpop.permute.xlu0 %922 }
 0x3de   : > { %v1573_v38 = vpop.f32.mrf.mxu1  ;;  %v1651_v32 = vadd.f32 %v1650_v22, %v1620_v39  ;;  %v1167_v0 = vadd.f32 %v3555_v47, %v923_v14  ;;  %v1636_v59 = vadd.f32 %v1635_v57, %v1614_v63  ;;  %v1622_v52 = vmul.f32 %v3556_v53, %v1122_v12  ;;  %v1879_v63 = vld [vmem:[%s3500_s8 + $0x8] sm:$0xff] }
 0x3df   : > { %v1659_v36 = vadd.f32 %v1658_v24, %v1625_v7  ;;  %v1628_v37 = vmul.f32 %v1573_v38, %v1152_v35  ;;  %v1644_v50 = vadd.f32 %v1643_v27, %v1619_v3  ;;  %v1627_v49 = vmul.f32 %v3372_v17, %v1147_v16  ;;  %v1788_v51 = vpop.permute.xlu1 %1787 }
 0x3e0   : > { %v2509_v31 = vpop.f32.mrf.mxu1  ;;  %v1652_v18 = vadd.f32 %v1651_v32, %v1624_v10  ;;  %v1162_v43 = vadd.f32 %v3557_v8, %v918_v15  ;;  %v1637_v28 = vadd.f32 %v1636_v59, %v1618_v29  ;;  %v1626_v35 = vmul.f32 %v3385_v6, %v3394_v19  ;;  %v1782_v19 = vld [vmem:[%s3498_s6 + $0x8] sm:$0xff] }
 0x3e1   : > { %v1660_v4 = vadd.f32 %v1659_v36, %v1629_v25  ;;  %v1645_v48 = vadd.f32 %v1644_v50, %v1623_v42  ;;  %v1631_v38 = vmul.f32 %v2509_v31, %v1167_v0  ;;  %v1878_v31 = vld [vmem:[%s3500_s8] sm:$0xff] }
 0x3e2   : > { %v1583_v21 = vpop.f32.mrf.mxu1  ;;  %v1638_v44 = vadd.f32 %v1637_v28, %v1622_v52 }
 0x3e3   : > { %v1646_v9 = vadd.f32 %v1645_v48, %v1627_v49  ;;  %v1630_v11 = vmul.f32 %v1583_v21, %v1162_v43  ;;  %v1793_v21 = vpop.permute.xlu0 %1792  ;;  %v2054_v29 = vpop.permute.xlu1 %2053 }
 0x3e4   : > { %v2512_v26 = vpop.f32.mrf.mxu1  ;;  %v1639_v16 = vadd.f32 %v1638_v44, %v1626_v35 }
 0x3e5   : > { %v1633_v60 = vmul.f32 %v2512_v26, %v1177_v34  ;;  %v1653_v34 = vadd.f32 %v1652_v18, %v1628_v37 }
 0x3e6   : > { %v1593_v5 = vpop.f32.mrf.mxu1  ;;  %v1640_v45 = vadd.f32 %v1639_v16, %v1630_v11 }
 0x3e7   : > { %v1632_v41 = vmul.f32 %v1593_v5, %v1172_v40  ;;  %v1661_v1 = vadd.f32 %v1660_v4, %v1633_v60  ;;  %v1647_v40 = vadd.f32 %v1646_v9, %v1631_v38  ;;  %v2049_v42 = vpop.permute.xlu0 %2048  ;;  %v2068_v37 = vpop.permute.xlu1 %2067 }
 0x3e8   : > { %v2517_v23 = vpop.f32.mrf.mxu1 }
 0x3e9   : > { %v1654_v13 = vadd.f32 %v1653_v34, %v1632_v41  ;;  %v1778_v20 = vmul.f32 %v2517_v23, %v1647_v40 }
 0x3ea   : > { %v1758_v54 = vpop.f32.mrf.mxu1 }
 0x3eb   : > { %v1777_v6 = vmul.f32 %v1758_v54, %v1640_v45  ;;  %v2063_v0 = vpop.permute.xlu0 %2062 }
 0x3ec   : > { %v2520_v12 = vpop.f32.mrf.mxu1 }
 0x3ed   : > { %v1780_v56 = vmul.f32 %v2520_v12, %v1661_v1 }
 0x3ee   : > { %v1768_v17 = vpop.f32.mrf.mxu1 }
 0x3ef   : > { %v1779_v62 = vmul.f32 %v1768_v17, %v1654_v13  ;;  %2521 = vmatprep.subr.mxu1 %v1780_v56 }
 0x3f0   : > { %2522 = vmatpush3.msra.mxu1 %v1780_v56 }
 0x3f1   : > { %2523 = vmatprep.subr.mxu1 %v1779_v62 }
 0x3f2   : > { %2524 = vmatpush3.msra.mxu1 %v1779_v62 }
 0x3f3   : > { %2525 = vmatprep.subr.mxu1 %v1778_v20 }
 0x3f4   : > { %2526 = vmatpush3.msra.mxu1 %v1778_v20 }
 0x3f5   : > { %2527 = vmatprep.subr.mxu1 %v1777_v6 }
 0x3f6   : > { %2528 = vmatpush3.msra.mxu1 %v1777_v6 }
 0x3f7   : > { %2530 = vmatmul.mubr.msk.f32.vlgmr.msra.gmra.mxu1 %vm1280_vm1, %v1782_v19 }
 0x3f8   : > { %2536 = vmatprep.mubr.msk.f32.mxu1 %vm462_vm0, %v1878_v31 }
 0x4b7   : > { %v2531_v58 = vpop.f32.mrf.mxu1 }
 0x4b8   : > { %v1873_v39 = vadd.f32 %v2531_v58, %v1793_v21 }
 0x4b9   : > { %v1867_v7 = vpop.f32.mrf.mxu1 }
 0x4ba   : > { %v1877_v2 = vmax.f32 %v1873_v39, 0.0  ;;  %v1868_v61 = vadd.f32 %v1867_v7, %v1788_v51 }
 0x4bc   : > { %v1876_v55 = vmax.f32 %v1868_v61, 0.0  ;;  %2532 = vmatprep.subr.mxu1 %v1877_v2 }
 0x4bd   : > { %2533 = vmatpush3.msra.mxu1 %v1877_v2 }
 0x4be   : > { %2534 = vmatprep.subr.mxu1 %v1876_v55 }
 0x4bf   : > { %2535 = vmatpush3.msra.mxu1 %v1876_v55 }
 0x4c0   : > { %2537 = vmatmul.mubr.msk.f32.vlgmr.msra.gmra.mxu1 %vm462_vm0, %v1879_v63 }
 0x4c1   : > { %2543 = vmatprep.mubr.msk.f32.mxu1 %vm462_vm0, %v1878_v31 }
 0x580   : > { %v2538_v33 = vpop.f32.mrf.mxu1 }
 0x581   : > { %v1962_v3 = vsub.f32 %v1877_v2, %v2538_v33 }
 0x582   : > { %v1952_v26 = vpop.f32.mrf.mxu1 }
 0x583   : > { %v1964_v22 = vmul.f32 %v1962_v3, %v1962_v3  ;;  %v1961_v24 = vsub.f32 %v1876_v55, %v1952_v26 }
 0x585   : > { %v1963_v10 = vmul.f32 %v1961_v24, %v1961_v24  ;;  %2539 = vmatprep.subr.mxu1 %v1964_v22 }
 0x586   : > { %2540 = vmatpush3.msra.mxu1 %v1964_v22 }
 0x587   : > { %2541 = vmatprep.subr.mxu1 %v1963_v10 }
 0x588   : > { %2542 = vmatpush3.msra.mxu1 %v1963_v10 }
 0x589   : > { %2544 = vmatmul.mubr.msk.f32.vlgmr.msra.gmra.mxu1 %vm462_vm0, %v1879_v63 }
 0x649   : > { %v2545_v25 = vpop.f32.mrf.mxu1 }
 0x64a   : > { %v2037_v57 = vadd.f32 1e-05, %v2545_v25 }
 0x64b   : > { %v2031_v27 = vpop.f32.mrf.mxu1 }
 0x64c   : > { %2627 = vrsqrt.f32 %v2037_v57  ;;  %v2032_v46 = vadd.f32 1e-05, %v2031_v27 }
 0x64e   : > { %2629 = vrsqrt.f32 %v2032_v46 }
 0x659   : > { %v2628_v30 = vpop.eup %2627 }
 0x65a   : > { %v2043_v5 = vmul.f32 %v2628_v30, %v1962_v3 }
 0x65b   : > { %v2630_v14 = vpop.eup %2629 }
 0x65c   : > { %v2042_v32 = vmul.f32 %v2630_v14, %v1961_v24  ;;  %v2057_v36 = vmul.f32 %v2054_v29, %v2043_v5 }
 0x65e   : > { %v2056_v60 = vmul.f32 %v2049_v42, %v2042_v32  ;;  %v2071_v47 = vadd.f32 %v2068_v37, %v2057_v36 }
 0x660   : > { %v2070_v59 = vadd.f32 %v2063_v0, %v2056_v60  ;;  %2073 = vst [vmem:[%s416_s13 + $0x8] sm:$0xff] %v2071_v47 }
 0x662   : > { %2072 = vst [vmem:[%s416_s13] sm:$0xff] %v2070_v59 }
 0x663   : > { %2644 = shalt.err (!%p2641_p5)
}
 0x664   : > { %s2645_s0 = scalar_lea.hbm %s3443_s16, 256  ;;  %s2649_s23 = scalar_lea.hbm %s3503_s11, 512 }
 0x665   : > { %p2646_p6 = scmp.ne.s32.totalorder %s3443_s16, %s2645_s0  ;;  %p2650_p10 = scmp.lt.s32.totalorder %s3443_s16, %s3503_s11 }
 0x666   : > { %p2651_p11 = scmp.lt.s32.totalorder %s2649_s23, %s2645_s0 }
 0x667   : > { %p2647_p7 = pnand %p2646_p6, %p2813_p4 }
 0x668   : > { %p2652_p12 = por %p2651_p11, %p2650_p10 }
 0x669   : > { %p2648_p9 = pneg %p2647_p7 }
 0x66b   : > { %p2653_p13 = pnand %p2652_p12, %p2648_p9 }
 0x66d   : > { %2656 = shalt.err (!%p2653_p13)
}
 0x66e   : > { %s2711_s24 = smov 128   ;;  %s2712_s28 = smov 8  }
 0x66f   : > { %2547 = dma.vmem_to_hbm [thread:$0]  (%p2813_p4), %s3445_s15, 256, %s3443_s16, %s3447_s20, %s2711_s24, %s2711_s24, %s2712_s28  }
 0x670 PF: > { %p2553_p0 = scmp.ge.s32.totalorder %s2707_s22, 2  ;;  %s2104_s12 = sand.u32 1, %s2687_s17  }
 0x671   : > { %s2105_s1 = scalar_lea.sflag [#allocation3], %s2104_s12 }
 0x672   : > { %p2550_p1 = pnand %p2553_p0, %p2820_p8 }
 0x674   : > { %p2551_p2 = pneg %p2550_p1 }
 0x676   : > { %2682 = dma.done.wait (%p2551_p2), %s2105_s1, 256  }
 0x677   : > { %2684 = vsyncadd (%p2551_p2), %s2105_s1, 4294967040  ;;  %s24_s22 = sadd.s32 1, %s2707_s22   ;;  %s3558_s17 = smov %s2691_s18 }
 0x678   : > { %p21_p3 = scmp.ge.s32.totalorder %s24_s22, 4   ;;  %s3559_s18 = smov %s2695_s19 }
 0x679   : > { %s3560_s19 = smov %s2826_s30  ;;  %s3561_s20 = smov %s2703_s21 }
 0x67a   : > { %s3562_s21 = smov %s3564_s25  ;;  %23 = sbr.rel (!%p21_p3) target bundleno = 7 (0x7), region = 102 }
 0x67f   :  { %2110 = vsyncpa [#allocation3], 1 }
 0x680   :  { %2112 = vsyncpa [#allocation3 + $0x1], 1 }

</bundles_post_ra>
